<compile_context>
chip_gen: v7x
topology: tpu7x:2x2x1
jax: 0.10.0
libtpu: 0.0.40
codegen_flags: <defaults>
</compile_context>

<pallas_src>
import functools

import jax
import jax.numpy as jnp
from jax.experimental import pallas as pl
from jax.experimental.pallas import tpu as pltpu

_EPS = 1e-5
_LANE = 128


def _round_up(x, m):
    return ((x + m - 1) // m) * m


def _choose_tm(m):
    """Row tile for the matmul grid."""
    if m >= 256:
        return 256
    return _round_up(max(m, 8), 8)


def _choose_elem_tm(mp):
    """Row tile for the mem-bound elementwise epilogue (as large as divides)."""
    for t in (2048, 1024, 512, 256, 128, 64, 32, 16, 8):
        if mp >= t and mp % t == 0:
            return t
    return mp


# ----------------------------- Pallas kernels ------------------------------

def conv_matmul_kernel(p_ref, w_ref, y_ref, part_ref):
    """Row-tiled conv-as-matmul; emits bf16 y tile + f32 per-tile (sum, sumsq).

    p: (TM, K) bf16 with K the *true* contraction size (Mosaic lane-pads in
    VMEM only); w: (K, Cp) bf16, resident across the row grid.
    Partial statistics are written to a grid-indexed output so the row axis is
    safely "parallel"; zero-padded rows of p contribute zero to the sums.
    """
    y = jnp.dot(p_ref[...], w_ref[...], preferred_element_type=jnp.float32)
    y_ref[...] = y.astype(y_ref.dtype)
    s = jnp.sum(y, axis=0, keepdims=True)           # (1, Cp)
    q = jnp.sum(y * y, axis=0, keepdims=True)       # (1, Cp)
    part_ref[...] = jnp.concatenate([s, q], axis=0)[None]   # (1, 2, Cp)


def residual_bn_relu_kernel(y2_ref, s2_ref, ys_ref, ss_ref, o_ref):
    """out = relu(bn2(y2) + bn_sc(ysc)); identity shortcut uses scale=1,shift=0."""
    main = y2_ref[...].astype(jnp.float32) * s2_ref[0:1, :] + s2_ref[1:2, :]
    short = ys_ref[...].astype(jnp.float32) * ss_ref[0:1, :] + ss_ref[1:2, :]
    o_ref[...] = jnp.maximum(main + short, 0.0)


# ----------------------------- pallas_call glue -----------------------------

def conv_matmul(p, w, tm):
    """p: (Mp, K) bf16, w: (K, Cp) bf16 -> (y bf16 (Mp, Cp), partials (G, 2, Cp))."""
    mp, k = p.shape
    cp = w.shape[1]
    grid = mp // tm
    return pl.pallas_call(
        conv_matmul_kernel,
        out_shape=(jax.ShapeDtypeStruct((mp, cp), jnp.bfloat16),
                   jax.ShapeDtypeStruct((grid, 2, cp), jnp.float32)),
        grid=(grid,),
        in_specs=[pl.BlockSpec((tm, k), lambda i: (i, 0)),
                  pl.BlockSpec((k, cp), lambda i: (0, 0))],
        out_specs=[pl.BlockSpec((tm, cp), lambda i: (i, 0)),
                   pl.BlockSpec((1, 2, cp), lambda i: (i, 0, 0))],
        compiler_params=pltpu.CompilerParams(
            dimension_semantics=("parallel",)),
    )(p, w)


def residual_bn_relu_apply(y2, stats2, ysc, stats_sc):
    mp, cp = y2.shape
    tm = _choose_elem_tm(mp)
    return pl.pallas_call(
        residual_bn_relu_kernel,
        out_shape=jax.ShapeDtypeStruct((mp, cp), jnp.float32),
        grid=(mp // tm,),
        in_specs=[pl.BlockSpec((tm, cp), lambda i: (i, 0)),
                  pl.BlockSpec((2, cp), lambda i: (0, 0)),
                  pl.BlockSpec((tm, cp), lambda i: (i, 0)),
                  pl.BlockSpec((2, cp), lambda i: (0, 0))],
        out_specs=pl.BlockSpec((tm, cp), lambda i: (i, 0)),
        compiler_params=pltpu.CompilerParams(
            dimension_semantics=("parallel",)),
    )(y2, stats2, ysc, stats_sc)


# ------------------------------- JAX glue -----------------------------------

def _im2col(x_nhwc, ksize, stride, pad):
    """Extract (ksize x ksize) patches -> (B*Ho*Wo, ksize*ksize*C)."""
    b, h, w, c = x_nhwc.shape
    xp = jnp.pad(x_nhwc, ((0, 0), (pad, pad), (pad, pad), (0, 0)))
    ho = (h + 2 * pad - ksize) // stride + 1
    wo = (w + 2 * pad - ksize) // stride + 1
    cols = []
    for dy in range(ksize):
        for dx in range(ksize):
            cols.append(xp[:, dy:dy + stride * ho:stride,
                           dx:dx + stride * wo:stride, :])
    patches = jnp.stack(cols, axis=3)                 # (B, Ho, Wo, K*K, C)
    return patches.reshape(b * ho * wo, ksize * ksize * c), ho, wo


def _w_to_mat(w_oihw, cp):
    """(Cout, Cin, kh, kw) -> (kh*kw*Cin, Cp) bf16, matching im2col column order."""
    cout, cin, kh, kw = w_oihw.shape
    wm = jnp.transpose(w_oihw, (2, 3, 1, 0)).reshape(kh * kw * cin, cout)
    return jnp.pad(wm, ((0, 0), (0, cp - cout))).astype(jnp.bfloat16)


def _pad_rows(mat, mp):
    return jnp.pad(mat, ((0, mp - mat.shape[0]), (0, 0)))


def _finalize_stats(partials, gamma, beta, n_valid, cp):
    """Per-tile (sum, sumsq) partials -> per-channel (scale, shift) (2, Cp) f32."""
    tot = jnp.sum(partials, axis=0)                   # (2, Cp)
    mean = tot[0] / n_valid
    var = jnp.maximum(tot[1] / n_valid - mean * mean, 0.0)
    g = jnp.pad(gamma.astype(jnp.float32), (0, cp - gamma.shape[0]))
    b = jnp.pad(beta.astype(jnp.float32), (0, cp - beta.shape[0]))
    scale = g * jax.lax.rsqrt(var + _EPS)
    shift = b - mean * scale
    return jnp.stack([scale, shift], axis=0)          # (2, Cp)


@functools.partial(jax.jit, static_argnames=("stride",))
def basic_block_forward(x_nchw, params, stride=1):
    # NHWC, bf16 MXU operand dtype from the start (halves im2col intermediates).
    x = jnp.transpose(x_nchw, (0, 2, 3, 1)).astype(jnp.bfloat16)
    b, h, w, cin = x.shape
    cout = params["conv1"].shape[0]
    cp = _round_up(cout, _LANE)

    # ---- conv1 (im2col matmul, K unpadded in HBM) + BN1 partial stats ----
    p1, ho, wo = _im2col(x, 3, stride, 1)             # (m, 9*cin) bf16
    m = b * ho * wo
    tm = _choose_tm(m)
    mp = _round_up(m, tm)
    w1 = _w_to_mat(params["conv1"], cp)               # (9*cin, Cp) bf16
    y1, part1 = conv_matmul(_pad_rows(p1, mp), w1, tm)
    stats1 = _finalize_stats(part1, params["g1"], params["b1"], m, cp)

    # ---- BN1 + ReLU fused into the XLA producer of the conv2 im2col ----
    out1 = jnp.maximum(
        y1[:m, :cout].astype(jnp.float32) * stats1[0, :cout] + stats1[1, :cout],
        0.0).astype(jnp.bfloat16)
    p2, _, _ = _im2col(out1.reshape(b, ho, wo, cout), 3, 1, 1)  # (m, 9*cout) bf16
    w2 = _w_to_mat(params["conv2"], cp)
    y2, part2 = conv_matmul(_pad_rows(p2, mp), w2, tm)
    stats2 = _finalize_stats(part2, params["g2"], params["b2"], m, cp)

    # ---- shortcut ----
    projection = (stride != 1) or (cin != cout)
    if projection:
        xs = x[:, ::stride, ::stride, :].reshape(m, cin)        # bf16 1x1-conv input
        ws = _w_to_mat(params["convs"], cp)                     # (cin, Cp) bf16
        ysc, part_sc = conv_matmul(_pad_rows(xs, mp), ws, tm)
        stats_sc = _finalize_stats(part_sc, params["gs"], params["bs"], m, cp)
    else:
        # identity shortcut: padded bf16 view of x with unit scale / zero shift
        ysc = jnp.pad(x.reshape(m, cin), ((0, mp - m), (0, cp - cin)))
        stats_sc = jnp.concatenate(
            [jnp.ones((1, cp), jnp.float32), jnp.zeros((1, cp), jnp.float32)],
            axis=0)

    # ---- BN2 + shortcut BN + residual add + ReLU (large lane-dense tiles) ----
    out = residual_bn_relu_apply(y2, stats2, ysc, stats_sc)     # (Mp, Cp) f32
    out = out[:m, :cout].reshape(b, ho, wo, cout)
    return jnp.transpose(out, (0, 3, 1, 2))                     # NCHW


# ----------------------------- reference & init -----------------------------

def _reference_block(x, params, stride):
    def conv(x_, w_, s, p):
        return jax.lax.conv_general_dilated(
            x_, w_, (s, s), [(p, p), (p, p)],
            dimension_numbers=("NCHW", "OIHW", "NCHW"))

    def bn(y, g, b2):
        mu = y.mean(axis=(0, 2, 3), keepdims=True)
        v = y.var(axis=(0, 2, 3), keepdims=True)
        return ((y - mu) * jax.lax.rsqrt(v + _EPS) * g.reshape(1, -1, 1, 1)
                + b2.reshape(1, -1, 1, 1))

    cin = x.shape[1]
    cout = params["conv1"].shape[0]
    out = jax.nn.relu(bn(conv(x, params["conv1"], stride, 1),
                         params["g1"], params["b1"]))
    out = bn(conv(out, params["conv2"], 1, 1), params["g2"], params["b2"])
    if stride != 1 or cin != cout:
        sc = bn(conv(x, params["convs"], stride, 0), params["gs"], params["bs"])
    else:
        sc = x
    return jax.nn.relu(out + sc)


def _init_params(key, cin, cout):
    ks = jax.random.split(key, 9)
    f32 = jnp.float32
    return {
        "conv1": 0.2 * jax.random.normal(ks[0], (cout, cin, 3, 3), f32),
        "g1": 1.0 + 0.1 * jax.random.normal(ks[1], (cout,), f32),
        "b1": 0.1 * jax.random.normal(ks[2], (cout,), f32),
        "conv2": 0.2 * jax.random.normal(ks[3], (cout, cout, 3, 3), f32),
        "g2": 1.0 + 0.1 * jax.random.normal(ks[4], (cout,), f32),
        "b2": 0.1 * jax.random.normal(ks[5], (cout,), f32),
        "convs": 0.3 * jax.random.normal(ks[6], (cout, cin, 1, 1), f32),
        "gs": 1.0 + 0.1 * jax.random.normal(ks[7], (cout,), f32),
        "bs": 0.1 * jax.random.normal(ks[8], (cout,), f32),
    }


# ---------------------------------- main -------------------------------------

if __name__ == "__main__":
    key = jax.random.PRNGKey(0)

    configs = [
        # (batch, in_channels, out_channels, H, W, stride)
        (2, 4, 8, 16, 16, 1),   # projection shortcut (channel change)
        (2, 8, 8, 16, 16, 1),   # identity shortcut
        (2, 4, 8, 16, 16, 2),   # projection shortcut with stride 2
    ]

    for i, (b, cin, cout, h, w, stride) in enumerate(configs):
        kx, kp = jax.random.split(jax.random.fold_in(key, i))
        x = jax.random.normal(kx, (b, cin, h, w), jnp.float32)
        params = _init_params(kp, cin, cout)

        out = jax.block_until_ready(basic_block_forward(x, params, stride=stride))
        ref = jax.block_until_ready(_reference_block(x, params, stride))

        assert out.shape == ref.shape, (out.shape, ref.shape)
        max_err = float(jnp.max(jnp.abs(out - ref)))
        # bf16 MXU operands + bf16 conv outputs (f32 accumulation / BN math)
        assert jnp.allclose(out, ref, atol=3e-2, rtol=3e-2), (
            f"mismatch for config {i}: max err {max_err}")

    print("KERNEL_OK")
</pallas_src>

<mosaic_0001>
module attributes {stable_mosaic.version = 11 : i64} {
  func.func @conv_matmul_kernel(%arg0: i32, %arg1: memref<256x36xbf16, #tpu.memory_space<vmem>>, %arg2: memref<36x128xbf16, #tpu.memory_space<vmem>>, %arg3: memref<256x128xbf16, #tpu.memory_space<vmem>>, %arg4: memref<1x2x128xf32, #tpu.memory_space<vmem>>) attributes {dimension_semantics = [#tpu.dimension_semantics<parallel>], iteration_bounds = array<i64: 2>, scalar_prefetch = 0 : i64, scratch_operands = 0 : i64, tpu.core_type = #tpu.core_type<tc>, window_params = [{transform_indices = @transform_0, window_bounds = array<i64: 256, 36>}, {pipeline_mode = #tpu.pipeline_mode<synchronous>, transform_indices = @transform_1, window_bounds = array<i64: 36, 128>}, {transform_indices = @transform_2, window_bounds = array<i64: 256, 128>}, {transform_indices = @transform_3, window_bounds = array<i64: 1, 2, 128>}]} {
    %c0 = arith.constant 0 : index
    %c0_0 = arith.constant 0 : index
    %0 = vector.load %arg1[%c0, %c0_0] : memref<256x36xbf16, #tpu.memory_space<vmem>>, vector<256x36xbf16>
    %c0_1 = arith.constant 0 : index
    %c0_2 = arith.constant 0 : index
    %1 = vector.load %arg2[%c0_1, %c0_2] : memref<36x128xbf16, #tpu.memory_space<vmem>>, vector<36x128xbf16>
    %cst = arith.constant dense<0.000000e+00> : vector<256x128xf32>
    %2 = tpu.matmul %0, %1, %cst {dimension_numbers = #tpu.dot_dimension_numbers<[1], [0], [0], [1], [0, 0, 1, 1], [], []>} : vector<256x36xbf16>, vector<36x128xbf16>, vector<256x128xf32> -> vector<256x128xf32>
    %3 = arith.truncf %2 : vector<256x128xf32> to vector<256x128xbf16>
    %c0_3 = arith.constant 0 : index
    %c0_4 = arith.constant 0 : index
    %4 = vector.load %arg3[%c0_3, %c0_4] : memref<256x128xbf16, #tpu.memory_space<vmem>>, vector<256x128xbf16>
    tpu.vector_store %arg3[%c0_3, %c0_4], %3 {strides = array<i32>} : memref<256x128xbf16, #tpu.memory_space<vmem>>, vector<256x128xbf16>,
    %cst_5 = arith.constant dense<0.000000e+00> : vector<128xf32>
    %5 = vector.multi_reduction <add>, %2, %cst_5 [0] : vector<256x128xf32> to vector<128xf32>
    %6 = vector.shape_cast %5 : vector<128xf32> to vector<1x128xf32>
    %7 = arith.mulf %2, %2 : vector<256x128xf32>
    %cst_6 = arith.constant dense<0.000000e+00> : vector<128xf32>
    %8 = vector.multi_reduction <add>, %7, %cst_6 [0] : vector<256x128xf32> to vector<128xf32>
    %9 = vector.shape_cast %8 : vector<128xf32> to vector<1x128xf32>
    %10 = tpu.concatenate %6, %9 in 0 : vector<1x128xf32>, vector<1x128xf32> -> vector<2x128xf32>
    %11 = vector.shape_cast %10 : vector<2x128xf32> to vector<1x2x128xf32>
    %c0_7 = arith.constant 0 : index
    %c0_8 = arith.constant 0 : index
    %c0_9 = arith.constant 0 : index
    %12 = vector.load %arg4[%c0_7, %c0_8, %c0_9] : memref<1x2x128xf32, #tpu.memory_space<vmem>>, vector<1x2x128xf32>
    tpu.vector_store %arg4[%c0_7, %c0_8, %c0_9], %11 {strides = array<i32>} : memref<1x2x128xf32, #tpu.memory_space<vmem>>, vector<1x2x128xf32>,
    return
  }
  func.func @transform_0(%arg0: i32) -> (i32, i32) {
    %c0_i32 = arith.constant 0 : i32
    %c0_i32_0 = arith.constant 0 : i32
    return %arg0, %c0_i32 : i32, i32
  }
  func.func @transform_1(%arg0: i32) -> (i32, i32) {
    %c0_i32 = arith.constant 0 : i32
    %c0_i32_0 = arith.constant 0 : i32
    %c0_i32_1 = arith.constant 0 : i32
    return %c0_i32, %c0_i32_0 : i32, i32
  }
  func.func @transform_2(%arg0: i32) -> (i32, i32) {
    %c0_i32 = arith.constant 0 : i32
    %c0_i32_0 = arith.constant 0 : i32
    return %arg0, %c0_i32 : i32, i32
  }
  func.func @transform_3(%arg0: i32) -> (i32, i32, i32) {
    %c0_i32 = arith.constant 0 : i32
    %c0_i32_0 = arith.constant 0 : i32
    %c0_i32_1 = arith.constant 0 : i32
    return %arg0, %c0_i32, %c0_i32_0 : i32, i32, i32
  }
}

module attributes {stable_mosaic.version = 11 : i64} {
  func.func @conv_matmul_kernel(%arg0: i32, %arg1: memref<256x72xbf16, #tpu.memory_space<vmem>>, %arg2: memref<72x128xbf16, #tpu.memory_space<vmem>>, %arg3: memref<256x128xbf16, #tpu.memory_space<vmem>>, %arg4: memref<1x2x128xf32, #tpu.memory_space<vmem>>) attributes {dimension_semantics = [#tpu.dimension_semantics<parallel>], iteration_bounds = array<i64: 2>, scalar_prefetch = 0 : i64, scratch_operands = 0 : i64, tpu.core_type = #tpu.core_type<tc>, window_params = [{transform_indices = @transform_0, window_bounds = array<i64: 256, 72>}, {pipeline_mode = #tpu.pipeline_mode<synchronous>, transform_indices = @transform_1, window_bounds = array<i64: 72, 128>}, {transform_indices = @transform_2, window_bounds = array<i64: 256, 128>}, {transform_indices = @transform_3, window_bounds = array<i64: 1, 2, 128>}]} {
    %c0 = arith.constant 0 : index
    %c0_0 = arith.constant 0 : index
    %0 = vector.load %arg1[%c0, %c0_0] : memref<256x72xbf16, #tpu.memory_space<vmem>>, vector<256x72xbf16>
    %c0_1 = arith.constant 0 : index
    %c0_2 = arith.constant 0 : index
    %1 = vector.load %arg2[%c0_1, %c0_2] : memref<72x128xbf16, #tpu.memory_space<vmem>>, vector<72x128xbf16>
    %cst = arith.constant dense<0.000000e+00> : vector<256x128xf32>
    %2 = tpu.matmul %0, %1, %cst {dimension_numbers = #tpu.dot_dimension_numbers<[1], [0], [0], [1], [0, 0, 1, 1], [], []>} : vector<256x72xbf16>, vector<72x128xbf16>, vector<256x128xf32> -> vector<256x128xf32>
    %3 = arith.truncf %2 : vector<256x128xf32> to vector<256x128xbf16>
    %c0_3 = arith.constant 0 : index
    %c0_4 = arith.constant 0 : index
    %4 = vector.load %arg3[%c0_3, %c0_4] : memref<256x128xbf16, #tpu.memory_space<vmem>>, vector<256x128xbf16>
    tpu.vector_store %arg3[%c0_3, %c0_4], %3 {strides = array<i32>} : memref<256x128xbf16, #tpu.memory_space<vmem>>, vector<256x128xbf16>,
    %cst_5 = arith.constant dense<0.000000e+00> : vector<128xf32>
    %5 = vector.multi_reduction <add>, %2, %cst_5 [0] : vector<256x128xf32> to vector<128xf32>
    %6 = vector.shape_cast %5 : vector<128xf32> to vector<1x128xf32>
    %7 = arith.mulf %2, %2 : vector<256x128xf32>
    %cst_6 = arith.constant dense<0.000000e+00> : vector<128xf32>
    %8 = vector.multi_reduction <add>, %7, %cst_6 [0] : vector<256x128xf32> to vector<128xf32>
    %9 = vector.shape_cast %8 : vector<128xf32> to vector<1x128xf32>
    %10 = tpu.concatenate %6, %9 in 0 : vector<1x128xf32>, vector<1x128xf32> -> vector<2x128xf32>
    %11 = vector.shape_cast %10 : vector<2x128xf32> to vector<1x2x128xf32>
    %c0_7 = arith.constant 0 : index
    %c0_8 = arith.constant 0 : index
    %c0_9 = arith.constant 0 : index
    %12 = vector.load %arg4[%c0_7, %c0_8, %c0_9] : memref<1x2x128xf32, #tpu.memory_space<vmem>>, vector<1x2x128xf32>
    tpu.vector_store %arg4[%c0_7, %c0_8, %c0_9], %11 {strides = array<i32>} : memref<1x2x128xf32, #tpu.memory_space<vmem>>, vector<1x2x128xf32>,
    return
  }
  func.func @transform_0(%arg0: i32) -> (i32, i32) {
    %c0_i32 = arith.constant 0 : i32
    %c0_i32_0 = arith.constant 0 : i32
    return %arg0, %c0_i32 : i32, i32
  }
  func.func @transform_1(%arg0: i32) -> (i32, i32) {
    %c0_i32 = arith.constant 0 : i32
    %c0_i32_0 = arith.constant 0 : i32
    %c0_i32_1 = arith.constant 0 : i32
    return %c0_i32, %c0_i32_0 : i32, i32
  }
  func.func @transform_2(%arg0: i32) -> (i32, i32) {
    %c0_i32 = arith.constant 0 : i32
    %c0_i32_0 = arith.constant 0 : i32
    return %arg0, %c0_i32 : i32, i32
  }
  func.func @transform_3(%arg0: i32) -> (i32, i32, i32) {
    %c0_i32 = arith.constant 0 : i32
    %c0_i32_0 = arith.constant 0 : i32
    %c0_i32_1 = arith.constant 0 : i32
    return %arg0, %c0_i32, %c0_i32_0 : i32, i32, i32
  }
}

module attributes {stable_mosaic.version = 11 : i64} {
  func.func @conv_matmul_kernel(%arg0: i32, %arg1: memref<256x4xbf16, #tpu.memory_space<vmem>>, %arg2: memref<4x128xbf16, #tpu.memory_space<vmem>>, %arg3: memref<256x128xbf16, #tpu.memory_space<vmem>>, %arg4: memref<1x2x128xf32, #tpu.memory_space<vmem>>) attributes {dimension_semantics = [#tpu.dimension_semantics<parallel>], iteration_bounds = array<i64: 2>, scalar_prefetch = 0 : i64, scratch_operands = 0 : i64, tpu.core_type = #tpu.core_type<tc>, window_params = [{transform_indices = @transform_0, window_bounds = array<i64: 256, 4>}, {pipeline_mode = #tpu.pipeline_mode<synchronous>, transform_indices = @transform_1, window_bounds = array<i64: 4, 128>}, {transform_indices = @transform_2, window_bounds = array<i64: 256, 128>}, {transform_indices = @transform_3, window_bounds = array<i64: 1, 2, 128>}]} {
    %c0 = arith.constant 0 : index
    %c0_0 = arith.constant 0 : index
    %0 = vector.load %arg1[%c0, %c0_0] : memref<256x4xbf16, #tpu.memory_space<vmem>>, vector<256x4xbf16>
    %c0_1 = arith.constant 0 : index
    %c0_2 = arith.constant 0 : index
    %1 = vector.load %arg2[%c0_1, %c0_2] : memref<4x128xbf16, #tpu.memory_space<vmem>>, vector<4x128xbf16>
    %cst = arith.constant dense<0.000000e+00> : vector<256x128xf32>
    %2 = tpu.matmul %0, %1, %cst {dimension_numbers = #tpu.dot_dimension_numbers<[1], [0], [0], [1], [0, 0, 1, 1], [], []>} : vector<256x4xbf16>, vector<4x128xbf16>, vector<256x128xf32> -> vector<256x128xf32>
    %3 = arith.truncf %2 : vector<256x128xf32> to vector<256x128xbf16>
    %c0_3 = arith.constant 0 : index
    %c0_4 = arith.constant 0 : index
    %4 = vector.load %arg3[%c0_3, %c0_4] : memref<256x128xbf16, #tpu.memory_space<vmem>>, vector<256x128xbf16>
    tpu.vector_store %arg3[%c0_3, %c0_4], %3 {strides = array<i32>} : memref<256x128xbf16, #tpu.memory_space<vmem>>, vector<256x128xbf16>,
    %cst_5 = arith.constant dense<0.000000e+00> : vector<128xf32>
    %5 = vector.multi_reduction <add>, %2, %cst_5 [0] : vector<256x128xf32> to vector<128xf32>
    %6 = vector.shape_cast %5 : vector<128xf32> to vector<1x128xf32>
    %7 = arith.mulf %2, %2 : vector<256x128xf32>
    %cst_6 = arith.constant dense<0.000000e+00> : vector<128xf32>
    %8 = vector.multi_reduction <add>, %7, %cst_6 [0] : vector<256x128xf32> to vector<128xf32>
    %9 = vector.shape_cast %8 : vector<128xf32> to vector<1x128xf32>
    %10 = tpu.concatenate %6, %9 in 0 : vector<1x128xf32>, vector<1x128xf32> -> vector<2x128xf32>
    %11 = vector.shape_cast %10 : vector<2x128xf32> to vector<1x2x128xf32>
    %c0_7 = arith.constant 0 : index
    %c0_8 = arith.constant 0 : index
    %c0_9 = arith.constant 0 : index
    %12 = vector.load %arg4[%c0_7, %c0_8, %c0_9] : memref<1x2x128xf32, #tpu.memory_space<vmem>>, vector<1x2x128xf32>
    tpu.vector_store %arg4[%c0_7, %c0_8, %c0_9], %11 {strides = array<i32>} : memref<1x2x128xf32, #tpu.memory_space<vmem>>, vector<1x2x128xf32>,
    return
  }
  func.func @transform_0(%arg0: i32) -> (i32, i32) {
    %c0_i32 = arith.constant 0 : i32
    %c0_i32_0 = arith.constant 0 : i32
    return %arg0, %c0_i32 : i32, i32
  }
  func.func @transform_1(%arg0: i32) -> (i32, i32) {
    %c0_i32 = arith.constant 0 : i32
    %c0_i32_0 = arith.constant 0 : i32
    %c0_i32_1 = arith.constant 0 : i32
    return %c0_i32, %c0_i32_0 : i32, i32
  }
  func.func @transform_2(%arg0: i32) -> (i32, i32) {
    %c0_i32 = arith.constant 0 : i32
    %c0_i32_0 = arith.constant 0 : i32
    return %arg0, %c0_i32 : i32, i32
  }
  func.func @transform_3(%arg0: i32) -> (i32, i32, i32) {
    %c0_i32 = arith.constant 0 : i32
    %c0_i32_0 = arith.constant 0 : i32
    %c0_i32_1 = arith.constant 0 : i32
    return %arg0, %c0_i32, %c0_i32_0 : i32, i32, i32
  }
}

module attributes {stable_mosaic.version = 11 : i64} {
  func.func @residual_bn_relu_kernel(%arg0: i32, %arg1: memref<512x128xbf16, #tpu.memory_space<vmem>>, %arg2: memref<2x128xf32, #tpu.memory_space<vmem>>, %arg3: memref<512x128xbf16, #tpu.memory_space<vmem>>, %arg4: memref<2x128xf32, #tpu.memory_space<vmem>>, %arg5: memref<512x128xf32, #tpu.memory_space<vmem>>) attributes {dimension_semantics = [#tpu.dimension_semantics<parallel>], iteration_bounds = array<i64: 1>, scalar_prefetch = 0 : i64, scratch_operands = 0 : i64, tpu.core_type = #tpu.core_type<tc>, window_params = [{transform_indices = @transform_0, window_bounds = array<i64: 512, 128>}, {pipeline_mode = #tpu.pipeline_mode<synchronous>, transform_indices = @transform_1, window_bounds = array<i64: 2, 128>}, {transform_indices = @transform_2, window_bounds = array<i64: 512, 128>}, {pipeline_mode = #tpu.pipeline_mode<synchronous>, transform_indices = @transform_3, window_bounds = array<i64: 2, 128>}, {transform_indices = @transform_4, window_bounds = array<i64: 512, 128>}]} {
    %c0 = arith.constant 0 : index
    %c0_0 = arith.constant 0 : index
    %0 = vector.load %arg1[%c0, %c0_0] : memref<512x128xbf16, #tpu.memory_space<vmem>>, vector<512x128xbf16>
    %1 = arith.extf %0 : vector<512x128xbf16> to vector<512x128xf32>
    %c0_1 = arith.constant 0 : index
    %c0_2 = arith.constant 0 : index
    %2 = vector.load %arg2[%c0_1, %c0_2] : memref<2x128xf32, #tpu.memory_space<vmem>>, vector<1x128xf32>
    %3 = vector.broadcast %2 : vector<1x128xf32> to vector<512x128xf32>
    %4 = arith.mulf %1, %3 : vector<512x128xf32>
    %c1 = arith.constant 1 : index
    %c0_3 = arith.constant 0 : index
    %5 = vector.load %arg2[%c1, %c0_3] : memref<2x128xf32, #tpu.memory_space<vmem>>, vector<1x128xf32>
    %6 = vector.broadcast %5 : vector<1x128xf32> to vector<512x128xf32>
    %7 = arith.addf %4, %6 : vector<512x128xf32>
    %c0_4 = arith.constant 0 : index
    %c0_5 = arith.constant 0 : index
    %8 = vector.load %arg3[%c0_4, %c0_5] : memref<512x128xbf16, #tpu.memory_space<vmem>>, vector<512x128xbf16>
    %9 = arith.extf %8 : vector<512x128xbf16> to vector<512x128xf32>
    %c0_6 = arith.constant 0 : index
    %c0_7 = arith.constant 0 : index
    %10 = vector.load %arg4[%c0_6, %c0_7] : memref<2x128xf32, #tpu.memory_space<vmem>>, vector<1x128xf32>
    %11 = vector.broadcast %10 : vector<1x128xf32> to vector<512x128xf32>
    %12 = arith.mulf %9, %11 : vector<512x128xf32>
    %c1_8 = arith.constant 1 : index
    %c0_9 = arith.constant 0 : index
    %13 = vector.load %arg4[%c1_8, %c0_9] : memref<2x128xf32, #tpu.memory_space<vmem>>, vector<1x128xf32>
    %14 = vector.broadcast %13 : vector<1x128xf32> to vector<512x128xf32>
    %15 = arith.addf %12, %14 : vector<512x128xf32>
    %16 = arith.addf %7, %15 : vector<512x128xf32>
    %cst = arith.constant 0.000000e+00 : f32
    %17 = vector.broadcast %cst : f32 to vector<512x128xf32>
    %18 = arith.maximumf %16, %17 : vector<512x128xf32>
    %c0_10 = arith.constant 0 : index
    %c0_11 = arith.constant 0 : index
    %19 = vector.load %arg5[%c0_10, %c0_11] : memref<512x128xf32, #tpu.memory_space<vmem>>, vector<512x128xf32>
    tpu.vector_store %arg5[%c0_10, %c0_11], %18 {strides = array<i32>} : memref<512x128xf32, #tpu.memory_space<vmem>>, vector<512x128xf32>,
    return
  }
  func.func @transform_0(%arg0: i32) -> (i32, i32) {
    %c0_i32 = arith.constant 0 : i32
    %c0_i32_0 = arith.constant 0 : i32
    return %arg0, %c0_i32 : i32, i32
  }
  func.func @transform_1(%arg0: i32) -> (i32, i32) {
    %c0_i32 = arith.constant 0 : i32
    %c0_i32_0 = arith.constant 0 : i32
    %c0_i32_1 = arith.constant 0 : i32
    return %c0_i32, %c0_i32_0 : i32, i32
  }
  func.func @transform_2(%arg0: i32) -> (i32, i32) {
    %c0_i32 = arith.constant 0 : i32
    %c0_i32_0 = arith.constant 0 : i32
    return %arg0, %c0_i32 : i32, i32
  }
  func.func @transform_3(%arg0: i32) -> (i32, i32) {
    %c0_i32 = arith.constant 0 : i32
    %c0_i32_0 = arith.constant 0 : i32
    %c0_i32_1 = arith.constant 0 : i32
    return %c0_i32, %c0_i32_0 : i32, i32
  }
  func.func @transform_4(%arg0: i32) -> (i32, i32) {
    %c0_i32 = arith.constant 0 : i32
    %c0_i32_0 = arith.constant 0 : i32
    return %arg0, %c0_i32 : i32, i32
  }
}

</mosaic_0001>

<bundles_post_ra>
// kernel: basic_block_forward.4
= control target key start
LH: loop header
LB: loop body
LE: loop exit
PB: predicated region body
PF: predicated region fallthrough
CT: control target
= control target key end

     0   :  { %s1214_s12 = smov 0   ;;  %s1373_s0 = inlined_call_operand.vmem [shape: bf16[512,36], index: 0, kind: input, shape index: {}]   ;;  %s1374_s1 = inlined_call_operand.vmem [shape: bf16[36,128], index: 1, kind: input, shape index: {}]   ;;  %s1375_s2 = inlined_call_operand.vmem [shape: bf16[512,128], index: 2, kind: output, shape index: {0}]   ;;  %s1376_s3 = inlined_call_operand.vmem [shape: f32[2,2,128], index: 3, kind: output, shape index: {1}]  }
   0x1 LB: > { %s1220_s13 = sadd.s32 4294967295, %s1192_s12   ;;  %p892_p0 = scmp.ge.s32.totalorder %s1192_s12, 1  ;;  %s1192_s12 = sphi %s1214_s12, %s14_s12  }
   0x2   : > { %p141_p1 = scmp.lt.s32.totalorder %s1192_s12, 3 }
   0x4   : > { %p142_p2 = pnand %p892_p0, %p141_p1 }
   0x5   : > { %v1167_v0 = vld [vmem:[%s1374_s1] sm:$0xff] (!%p142_p2)   ;;  %v1168_v1 = vld [vmem:[%s1374_s1 + $0x8] sm:$0xff] (!%p142_p2)   ;;  %s893_s18 = sshll.u32 (!%p142_p2), %s1220_s13, 5  ;;  %v1169_v2 = vld [vmem:[%s1374_s1 + $0x10] ss:$0 sps:$4 sm:$0x33] (!%p142_p2)  }
   0x6   : > { %145 = sbr.rel (%p142_p2) target bundleno = 311 (0x137), region = 28  ;;  %1113 = vmatprep.subr.bf16.mxu0 (!%p142_p2), %v1167_v0  ;;  %p170_p3 = scmp.lt.s32.totalorder (!%p142_p2), %s893_s18, 63  ;;  %1151 = vmatprep.subr.bf16.mxu1 (!%p142_p2), %v1167_v0  ;;  %vm367_vm0 = vcmask (!%p142_p2), 1041408   ;;  %vm318_vm1 = vcmask (!%p142_p2), 293888   ;;  %vm798_vm2 = vcmask (!%p142_p2), 1040384  }
   0x7   : > { %1114 = vmatpush3.bf16.msra.mxu0 (!%p142_p2), %v1167_v0  ;;  %1154 = vmatpush3.bf16.msra.mxu1 (!%p142_p2), %v1167_v0  ;;  %v369_v3 = vsel (!%p142_p2), %vm367_vm0, %v1169_v2, 0  ;;  %p181_p4 = scmp.lt.s32.totalorder (!%p142_p2), %s1220_s13, 1 }
   0x8   : > { %1115 = vmatprep.subr.bf16.mxu0 (!%p142_p2), %v1168_v1  ;;  %1152 = vmatprep.subr.bf16.mxu1 (!%p142_p2), %v1168_v1 }
   0xb   : > { %1116 = vmatpush3.bf16.msra.mxu0 (!%p142_p2), %v1168_v1  ;;  %1155 = vmatpush3.bf16.msra.mxu1 (!%p142_p2), %v1168_v1 }
   0xc   : > { %1157 = vmatprep.subr.msk.bf16.mxu0 (!%p142_p2), %vm367_vm0, %v1169_v2  ;;  %1158 = vmatprep.subr.msk.bf16.mxu1 (!%p142_p2), %vm367_vm0, %v1169_v2 }
   0xd   : > { %s1378_s18 = smov (!%p170_p3, %s893_s18), 63  ;;  %s1380_s13 = smov (!%p181_p4, %s1220_s13), 1 }
   0xe   : > { %s894_s21 = sshll.u32 %s1378_s18, 2  ;;  %s897_s28 = sshll.u32 %s1380_s13, 1 }
   0xf   : > { %s1242_s24 = scalar_lea.vmem %s1373_s0, %s894_s21  ;;  %1118 = vmatpush3.bf16.msra.mxu0 %v369_v3  ;;  %1156 = vmatpush3.bf16.msra.mxu1 %v369_v3  ;;  %s1281_s27 = scalar_lea.vmem %s1375_s2, %s894_s21 }
  0x10   : > { %v1170_v4 = vld [vmem:[%s1242_s24] sm:$0xff]   ;;  %v1171_v5 = vld [vmem:[%s1242_s24 + $0x8] sm:$0xff]   ;;  %v1172_v6 = vld [vmem:[%s1242_s24 + $0x10] sm:$0xff]   ;;  %s184_s4 = scalar_lea.vmem %s1376_s3, %s897_s28 }
  0x11   : > { %1119 = vmatprep.mubr.msk.bf16.mxu0 %vm318_vm1, %v1170_v4  ;;  %v1173_v7 = vld [vmem:[%s1242_s24 + $0x18] sm:$0xff]   ;;  %v1178_v8 = vld [vmem:[%s1242_s24 + $0x40] sm:$0xff]   ;;  %v1179_v9 = vld [vmem:[%s1242_s24 + $0x48] sm:$0xff]  }
  0x12   : > { %1120 = vmatmul.mubr.msk.bf16.vlgmr.msra.gmra.mrb[0].mxu0 %vm318_vm1, %v1171_v5  ;;  %1135 = vmatprep.mubr.msk.bf16.mxu1 %vm318_vm1, %v1178_v8  ;;  %v1180_v10 = vld [vmem:[%s1242_s24 + $0x50] sm:$0xff]   ;;  %v1174_v11 = vld [vmem:[%s1242_s24 + $0x20] sm:$0xff]   ;;  %v1181_v12 = vld [vmem:[%s1242_s24 + $0x58] sm:$0xff]  }
  0x13   : > { %1123 = vmatprep.mubr.msk.bf16.mxu0 %vm318_vm1, %v1172_v6  ;;  %1136 = vmatmul.mubr.msk.bf16.vlgmr.msra.gmra.mrb[0].mxu1 %vm318_vm1, %v1179_v9  ;;  %v1182_v13 = vld [vmem:[%s1242_s24 + $0x60] sm:$0xff]   ;;  %v1175_v14 = vld [vmem:[%s1242_s24 + $0x28] sm:$0xff]   ;;  %v1176_v15 = vld [vmem:[%s1242_s24 + $0x30] sm:$0xff]  }
  0x14   : > { %1139 = vmatprep.mubr.msk.bf16.mxu1 %vm318_vm1, %v1180_v10  ;;  %v1183_v16 = vld [vmem:[%s1242_s24 + $0x68] sm:$0xff]   ;;  %v1184_v17 = vld [vmem:[%s1242_s24 + $0x70] sm:$0xff]   ;;  %v1177_v18 = vld [vmem:[%s1242_s24 + $0x38] sm:$0xff]  }
  0x15   : > { %v1185_v19 = vld [vmem:[%s1242_s24 + $0x78] sm:$0xff]  }
  0x1a   : > { %1124 = vmatmul.mubr.msk.bf16.gmra.mrb[4].mxu0 %vm318_vm1, %v1173_v7 }
  0x1b   : > { %1127 = vmatprep.mubr.msk.bf16.mxu0 %vm318_vm1, %v1174_v11  ;;  %1140 = vmatmul.mubr.msk.bf16.gmra.mrb[4].mxu1 %vm318_vm1, %v1181_v12 }
  0x1c   : > { %1143 = vmatprep.mubr.msk.bf16.mxu1 %vm318_vm1, %v1182_v13 }
  0x22   : > { %1128 = vmatmul.mubr.msk.bf16.gmra.mrb[8].mxu0 %vm318_vm1, %v1175_v14 }
  0x23   : > { %1131 = vmatprep.mubr.msk.bf16.mxu0 %vm318_vm1, %v1176_v15  ;;  %1144 = vmatmul.mubr.msk.bf16.gmra.mrb[8].mxu1 %vm318_vm1, %v1183_v16 }
  0x24   : > { %1147 = vmatprep.mubr.msk.bf16.mxu1 %vm318_vm1, %v1184_v17 }
  0x2a   : > { %1132 = vmatmul.mubr.msk.bf16.gmra.mrb[12].mxu0 %vm318_vm1, %v1177_v18 }
  0x2b   : > { %1148 = vmatmul.mubr.msk.bf16.gmra.mrb[12].mxu1 %vm318_vm1, %v1185_v19 }
  0xe5   : > { %v1121_v20 = vpop.f32.mrb[0].mxu0 }
  0xe6   : > { %v405_v21 = vpop.f32.mrb[1].mxu0  ;;  %v1284_v29 = vpop.f32.mrb[0].mxu1  ;;  %v731_v30 = vmul.f32 %v1121_v20, %v1121_v20 }
  0xe7   : > { %v1122_v22 = vpop.f32.mrb[2].mxu0  ;;  %v729_v25 = vmul.f32 %v405_v21, %v405_v21  ;;  %v1287_v33 = vpop.f32.mrb[1].mxu1 }
  0xe8   : > { %v1007_v23 = vpack.c.bf16 %v1122_v22, %v1121_v20  ;;  %v408_v24 = vpop.f32.mrb[3].mxu0  ;;  %v1289_v34 = vpop.f32.mrb[2].mxu1  ;;  %v732_v35 = vmul.f32 %v1122_v22, %v1122_v22 }
  0xe9   : > { %v1002_v26 = vpack.c.bf16 %v408_v24, %v405_v21  ;;  %v692_v27 = vadd.f32 %v408_v24, %v405_v21  ;;  %v730_v28 = vmul.f32 %v408_v24, %v408_v24  ;;  %v1047_v39 = vpack.c.bf16 %v1289_v34, %v1284_v29  ;;  %v1293_v40 = vpop.f32.mrb[3].mxu1 }
  0xea   : > { %1079 = vst [vmem:[%s1281_s27 + $0x8] sm:$0xff] %v1007_v23   ;;  %v1042_v42 = vpack.c.bf16 %v1293_v40, %v1287_v33 }
  0xeb   : > { %1003 = vst [vmem:[%s1281_s27] sm:$0xff] %v1002_v26   ;;  %v693_v31 = vadd.f32 %v1121_v20, %v692_v27  ;;  %v761_v32 = vadd.f32 %v730_v28, %v729_v25  ;;  %1087 = vst [vmem:[%s1281_s27 + $0x48] sm:$0xff] %v1047_v39  }
  0xec   : > { %1086 = vst [vmem:[%s1281_s27 + $0x40] sm:$0xff] %v1042_v42  }
  0xed   : > { %v762_v36 = vadd.f32 %v761_v32, %v731_v30  ;;  %v1125_v37 = vpop.f32.mrb[4].mxu0  ;;  %v694_v38 = vadd.f32 %v1122_v22, %v693_v31 }
  0xee   : > { %v421_v41 = vpop.f32.mrb[5].mxu0  ;;  %v1300_v53 = vpop.f32.mrb[4].mxu1  ;;  %v735_v54 = vmul.f32 %v1125_v37, %v1125_v37 }
  0xef   : > { %v695_v43 = vadd.f32 %v694_v38, %v421_v41  ;;  %v733_v44 = vmul.f32 %v421_v41, %v421_v41  ;;  %v763_v45 = vadd.f32 %v762_v36, %v732_v35  ;;  %v1126_v46 = vpop.f32.mrb[6].mxu0  ;;  %v1303_v57 = vpop.f32.mrb[5].mxu1 }
  0xf0   : > { %v1017_v47 = vpack.c.bf16 %v1126_v46, %v1125_v37  ;;  %v424_v48 = vpop.f32.mrb[7].mxu0  ;;  %v1305_v58 = vpop.f32.mrb[6].mxu1  ;;  %v736_v59 = vmul.f32 %v1126_v46, %v1126_v46 }
  0xf1   : > { %v764_v49 = vadd.f32 %v763_v45, %v733_v44  ;;  %v1012_v50 = vpack.c.bf16 %v424_v48, %v421_v41  ;;  %v696_v51 = vadd.f32 %v695_v43, %v424_v48  ;;  %v734_v52 = vmul.f32 %v424_v48, %v424_v48  ;;  %v1309_v0 = vpop.f32.mrb[7].mxu1 }
  0xf2   : > { %1081 = vst [vmem:[%s1281_s27 + $0x18] sm:$0xff] %v1017_v47   ;;  %v1057_v63 = vpack.c.bf16 %v1305_v58, %v1300_v53  ;;  %v1052_v2 = vpack.c.bf16 %v1309_v0, %v1303_v57 }
  0xf3   : > { %1080 = vst [vmem:[%s1281_s27 + $0x10] sm:$0xff] %v1012_v50   ;;  %v697_v55 = vadd.f32 %v1125_v37, %v696_v51  ;;  %v765_v56 = vadd.f32 %v764_v49, %v734_v52 }
  0xf4   : > { %1089 = vst [vmem:[%s1281_s27 + $0x58] sm:$0xff] %v1057_v63   ;;  %1088 = vst [vmem:[%s1281_s27 + $0x50] sm:$0xff] %v1052_v2   ;;  %v748_v2 = vmul.f32 %v1289_v34, %v1289_v34 }
  0xf5   : > { %v766_v60 = vadd.f32 %v765_v56, %v735_v54  ;;  %v1129_v61 = vpop.f32.mrb[8].mxu0  ;;  %v698_v62 = vadd.f32 %v1126_v46, %v697_v55  ;;  %v745_v46 = vmul.f32 %v1287_v33, %v1287_v33 }
  0xf6   : > { %v437_v1 = vpop.f32.mrb[9].mxu0  ;;  %v1316_v13 = vpop.f32.mrb[8].mxu1  ;;  %v739_v14 = vmul.f32 %v1129_v61, %v1129_v61 }
  0xf7   : > { %v699_v3 = vadd.f32 %v698_v62, %v437_v1  ;;  %v737_v4 = vmul.f32 %v437_v1, %v437_v1  ;;  %v767_v5 = vadd.f32 %v766_v60, %v736_v59  ;;  %v1130_v6 = vpop.f32.mrb[10].mxu0  ;;  %v1319_v17 = vpop.f32.mrb[9].mxu1  ;;  %v747_v62 = vmul.f32 %v1284_v29, %v1284_v29 }
  0xf8   : > { %v1027_v7 = vpack.c.bf16 %v1130_v6, %v1129_v61  ;;  %v440_v8 = vpop.f32.mrb[11].mxu0  ;;  %v1321_v18 = vpop.f32.mrb[10].mxu1  ;;  %v740_v19 = vmul.f32 %v1130_v6, %v1130_v6 }
  0xf9   : > { %v768_v9 = vadd.f32 %v767_v5, %v737_v4  ;;  %v1022_v10 = vpack.c.bf16 %v440_v8, %v437_v1  ;;  %v700_v11 = vadd.f32 %v699_v3, %v440_v8  ;;  %v738_v12 = vmul.f32 %v440_v8, %v440_v8  ;;  %v504_v24 = vpop.f32.mrb[11].mxu1 }
  0xfa   : > { %1083 = vst [vmem:[%s1281_s27 + $0x28] sm:$0xff] %v1027_v7   ;;  %v1067_v23 = vpack.c.bf16 %v1321_v18, %v1316_v13  ;;  %v1062_v26 = vpack.c.bf16 %v504_v24, %v1319_v17  ;;  %v749_v4 = vmul.f32 %v1303_v57, %v1303_v57  ;;  %v750_v8 = vmul.f32 %v1309_v0, %v1309_v0 }
  0xfb   : > { %1082 = vst [vmem:[%s1281_s27 + $0x20] sm:$0xff] %v1022_v10   ;;  %v701_v15 = vadd.f32 %v1129_v61, %v700_v11  ;;  %v769_v16 = vadd.f32 %v768_v9, %v738_v12  ;;  %v746_v61 = vmul.f32 %v1293_v40, %v1293_v40 }
  0xfc   : > { %1091 = vst [vmem:[%s1281_s27 + $0x68] sm:$0xff] %v1067_v23   ;;  %1090 = vst [vmem:[%s1281_s27 + $0x60] sm:$0xff] %v1062_v26  }
  0xfd   : > { %v770_v20 = vadd.f32 %v769_v16, %v739_v14  ;;  %v1133_v21 = vpop.f32.mrb[12].mxu0  ;;  %v702_v22 = vadd.f32 %v1130_v6, %v701_v15 }
  0xfe   : > { %v453_v25 = vpop.f32.mrb[13].mxu0  ;;  %v1149_v41 = vpop.f32.mrb[12].mxu1  ;;  %v743_v42 = vmul.f32 %v1133_v21, %v1133_v21 }
  0xff   : > { %v703_v27 = vadd.f32 %v702_v22, %v453_v25  ;;  %v741_v28 = vmul.f32 %v453_v25, %v453_v25  ;;  %v771_v30 = vadd.f32 %v770_v20, %v740_v19  ;;  %v1134_v31 = vpop.f32.mrb[14].mxu0  ;;  %v517_v45 = vpop.f32.mrb[13].mxu1  ;;  %v754_v19 = vmul.f32 %v504_v24, %v504_v24 }
 0x100   : > { %v1037_v32 = vpack.c.bf16 %v1134_v31, %v1133_v21  ;;  %v456_v35 = vpop.f32.mrb[15].mxu0  ;;  %v1150_v47 = vpop.f32.mrb[14].mxu1  ;;  %v744_v48 = vmul.f32 %v1134_v31, %v1134_v31  ;;  %v755_v20 = vmul.f32 %v1316_v13, %v1316_v13  ;;  %v756_v22 = vmul.f32 %v1321_v18, %v1321_v18 }
 0x101   : > { %v772_v36 = vadd.f32 %v771_v30, %v741_v28  ;;  %v1032_v37 = vpack.c.bf16 %v456_v35, %v453_v25  ;;  %v704_v38 = vadd.f32 %v703_v27, %v456_v35  ;;  %v742_v39 = vmul.f32 %v456_v35, %v456_v35  ;;  %v520_v52 = vpop.f32.mrb[15].mxu1 }
 0x102   : > { %1085 = vst [vmem:[%s1281_s27 + $0x38] sm:$0xff] %v1037_v32   ;;  %v1077_v51 = vpack.c.bf16 %v1150_v47, %v1149_v41  ;;  %v1072_v54 = vpack.c.bf16 %v520_v52, %v517_v45  ;;  %v757_v25 = vmul.f32 %v517_v45, %v517_v45  ;;  %v759_v30 = vmul.f32 %v1149_v41, %v1149_v41 }
 0x103   : > { %1084 = vst [vmem:[%s1281_s27 + $0x30] sm:$0xff] %v1032_v37   ;;  %v705_v43 = vadd.f32 %v1133_v21, %v704_v38  ;;  %v773_v44 = vadd.f32 %v772_v36, %v742_v39  ;;  %v760_v35 = vmul.f32 %v1150_v47, %v1150_v47 }
 0x104   : > { %1093 = vst [vmem:[%s1281_s27 + $0x78] sm:$0xff] %v1077_v51   ;;  %1092 = vst [vmem:[%s1281_s27 + $0x70] sm:$0xff] %v1072_v54  }
 0x105   : > { %v774_v49 = vadd.f32 %v773_v44, %v743_v42  ;;  %v706_v50 = vadd.f32 %v1134_v31, %v705_v43 }
 0x107   : > { %v707_v55 = vadd.f32 %v706_v50, %v1287_v33  ;;  %v775_v56 = vadd.f32 %v774_v49, %v744_v48 }
 0x109   : > { %v776_v59 = vadd.f32 %v775_v56, %v745_v46  ;;  %v708_v60 = vadd.f32 %v707_v55, %v1293_v40 }
 0x10b   : > { %v709_v63 = vadd.f32 %v1284_v29, %v708_v60  ;;  %v777_v1 = vadd.f32 %v776_v59, %v746_v61  ;;  %v751_v29 = vmul.f32 %v1300_v53, %v1300_v53 }
 0x10d   : > { %v778_v3 = vadd.f32 %v777_v1, %v747_v62  ;;  %v710_v33 = vadd.f32 %v1289_v34, %v709_v63  ;;  %v752_v34 = vmul.f32 %v1305_v58, %v1305_v58 }
 0x10f   : > { %v711_v5 = vadd.f32 %v710_v33, %v1303_v57  ;;  %v779_v6 = vadd.f32 %v778_v3, %v748_v2  ;;  %v753_v57 = vmul.f32 %v1319_v17, %v1319_v17 }
 0x111   : > { %v780_v7 = vadd.f32 %v779_v6, %v749_v4  ;;  %v712_v40 = vadd.f32 %v711_v5, %v1309_v0 }
 0x113   : > { %v713_v9 = vadd.f32 %v1300_v53, %v712_v40  ;;  %v781_v10 = vadd.f32 %v780_v7, %v750_v8 }
 0x115   : > { %v782_v11 = vadd.f32 %v781_v10, %v751_v29  ;;  %v714_v12 = vadd.f32 %v1305_v58, %v713_v9 }
 0x117   : > { %v715_v14 = vadd.f32 %v714_v12, %v1319_v17  ;;  %v783_v15 = vadd.f32 %v782_v11, %v752_v34 }
 0x119   : > { %v784_v16 = vadd.f32 %v783_v15, %v753_v57  ;;  %v716_v0 = vadd.f32 %v715_v14, %v504_v24  ;;  %v758_v24 = vmul.f32 %v520_v52, %v520_v52 }
 0x11b   : > { %v717_v53 = vadd.f32 %v1316_v13, %v716_v0  ;;  %v785_v21 = vadd.f32 %v784_v16, %v754_v19 }
 0x11d   : > { %v786_v23 = vadd.f32 %v785_v21, %v755_v20  ;;  %v718_v58 = vadd.f32 %v1321_v18, %v717_v53 }
 0x11f   : > { %v719_v26 = vadd.f32 %v718_v58, %v517_v45  ;;  %v787_v17 = vadd.f32 %v786_v23, %v756_v22 }
 0x121   : > { %v788_v27 = vadd.f32 %v787_v17, %v757_v25  ;;  %v720_v28 = vadd.f32 %v719_v26, %v520_v52 }
 0x123   : > { %v721_v31 = vadd.f32 %v1149_v41, %v720_v28  ;;  %v789_v32 = vadd.f32 %v788_v27, %v758_v24 }
 0x125   : > { %v722_v13 = vadd.f32 %v1150_v47, %v721_v31  ;;  %v790_v36 = vadd.f32 %v789_v32, %v759_v30 }
 0x127   : > { %v723_v37 = vrot.slane %v722_v13, 4  ;;  %v791_v38 = vadd.f32 %v790_v36, %v760_v35 }
 0x129   : > { %v724_v39 = vadd.f32 %v723_v37, %v722_v13  ;;  %v792_v42 = vrot.slane %v791_v38, 4 }
 0x12b   : > { %v725_v43 = vrot.slane %v724_v39, 2  ;;  %v793_v18 = vadd.f32 %v792_v42, %v791_v38 }
 0x12d   : > { %v726_v44 = vadd.f32 %v725_v43, %v724_v39  ;;  %v794_v45 = vrot.slane %v793_v18, 2 }
 0x12f   : > { %v727_v46 = vrot.slane %v726_v44, 1  ;;  %v795_v48 = vadd.f32 %v794_v45, %v793_v18 }
 0x131   : > { %v796_v49 = vrot.slane %v795_v48, 1  ;;  %v728_v41 = vadd.f32 %v727_v46, %v726_v44 }
 0x133   : > { %v797_v47 = vadd.f32 %v796_v49, %v795_v48 }
 0x135   : > { %v799_v50 = vsel %vm798_vm2, %v728_v41, %v797_v47 }
 0x136   : > { %800 = vst [vmem:[%s184_s4] sm:$0x3] %v799_v50 }
 0x137 PF: > { %s14_s12 = sadd.s32 1, %s1192_s12  }
 0x138   : > { %p11_p5 = scmp.ge.s32.totalorder %s14_s12, 4  }
 0x13a   :  { %13 = sbr.rel (!%p11_p5) target bundleno = 1 (0x1), region = 70 }

// kernel: basic_block_forward.5
= control target key start
LH: loop header
LB: loop body
LE: loop exit
PB: predicated region body
PF: predicated region fallthrough
CT: control target
= control target key end

     0   :  { %s1244_s12 = smov 0   ;;  %s1427_s0 = inlined_call_operand.vmem [shape: bf16[512,72], index: 0, kind: input, shape index: {}]   ;;  %s1428_s1 = inlined_call_operand.vmem [shape: bf16[72,128], index: 1, kind: input, shape index: {}]   ;;  %s1429_s2 = inlined_call_operand.vmem [shape: bf16[512,128], index: 2, kind: output, shape index: {0}]   ;;  %s1430_s3 = inlined_call_operand.vmem [shape: f32[2,2,128], index: 3, kind: output, shape index: {1}]  }
   0x1 LB: > { %s1250_s13 = sadd.s32 4294967295, %s1222_s12   ;;  %p908_p0 = scmp.ge.s32.totalorder %s1222_s12, 1  ;;  %s1222_s12 = sphi %s1244_s12, %s14_s12  }
   0x2   : > { %p141_p1 = scmp.lt.s32.totalorder %s1222_s12, 3 }
   0x4   : > { %p142_p2 = pnand %p908_p0, %p141_p1 }
   0x5   : > { %v1195_v0 = vld [vmem:[%s1428_s1] sm:$0xff] (!%p142_p2)   ;;  %v1196_v1 = vld [vmem:[%s1428_s1 + $0x8] sm:$0xff] (!%p142_p2)   ;;  %s909_s18 = sshll.u32 (!%p142_p2), %s1250_s13, 5  ;;  %v1197_v2 = vld [vmem:[%s1428_s1 + $0x10] sm:$0xff] (!%p142_p2)   ;;  %vm334_vm0 = vcmask (!%p142_p2), 588800   ;;  %vm383_vm1 = vcmask (!%p142_p2), 1043456  }
   0x6   : > { %145 = sbr.rel (%p142_p2) target bundleno = 319 (0x13f), region = 28  ;;  %1133 = vmatprep.subr.bf16.mxu0 (!%p142_p2), %v1195_v0  ;;  %p170_p3 = scmp.lt.s32.totalorder (!%p142_p2), %s909_s18, 63  ;;  %1175 = vmatprep.subr.bf16.mxu1 (!%p142_p2), %v1195_v0  ;;  %v1198_v3 = vld [vmem:[%s1428_s1 + $0x18] sm:$0xff] (!%p142_p2)   ;;  %v1199_v5 = vld [vmem:[%s1428_s1 + $0x20] ss:$0 sps:$4 sm:$0xff] (!%p142_p2)   ;;  %vm814_vm2 = vcmask (!%p142_p2), 1040384  }
   0x7   : > { %1134 = vmatpush3.bf16.msra.mxu0 (!%p142_p2), %v1195_v0  ;;  %1180 = vmatpush3.bf16.msra.mxu1 (!%p142_p2), %v1195_v0  ;;  %v385_v6 = vsel (!%p142_p2), %vm383_vm1, %v1199_v5, 0  ;;  %p181_p4 = scmp.lt.s32.totalorder (!%p142_p2), %s1250_s13, 1 }
   0x8   : > { %1135 = vmatprep.subr.bf16.mxu0 (!%p142_p2), %v1196_v1  ;;  %1176 = vmatprep.subr.bf16.mxu1 (!%p142_p2), %v1196_v1 }
   0xb   : > { %1136 = vmatpush3.bf16.msra.mxu0 (!%p142_p2), %v1196_v1  ;;  %1181 = vmatpush3.bf16.msra.mxu1 (!%p142_p2), %v1196_v1 }
   0xc   : > { %1137 = vmatprep.subr.bf16.mxu0 (!%p142_p2), %v1197_v2  ;;  %1177 = vmatprep.subr.bf16.mxu1 (!%p142_p2), %v1197_v2 }
   0xd   : > { %s1432_s18 = smov (!%p170_p3, %s909_s18), 63  ;;  %s1434_s13 = smov (!%p181_p4, %s1250_s13), 1 }
   0xe   : > { %s910_s21 = sshll.u32 %s1432_s18, 2  ;;  %s913_s5 = sshll.u32 %s1434_s13, 1 }
   0xf   : > { %s1275_s26 = scalar_lea.vmem %s1427_s0, %s910_s21  ;;  %1138 = vmatpush3.bf16.msra.mxu0 %v1197_v2  ;;  %1182 = vmatpush3.bf16.msra.mxu1 %v1197_v2  ;;  %s1321_s4 = scalar_lea.vmem %s1429_s2, %s910_s21 }
  0x10   : > { %v1200_v4 = vld [vmem:[%s1275_s26] sm:$0xff]   ;;  %1139 = vmatprep.subr.bf16.mxu0 %v1198_v3  ;;  %1178 = vmatprep.subr.bf16.mxu1 %v1198_v3  ;;  %v1201_v7 = vld [vmem:[%s1275_s26 + $0x8] sm:$0xff]   ;;  %v1202_v9 = vld [vmem:[%s1275_s26 + $0x10] sm:$0xff]   ;;  %s184_s8 = scalar_lea.vmem %s1430_s3, %s913_s5 }
  0x11   : > { %1143 = vmatprep.mubr.msk.bf16.mxu0 %vm334_vm0, %v1200_v4  ;;  %v1208_v8 = vld [vmem:[%s1275_s26 + $0x40] sm:$0xff]   ;;  %v1209_v10 = vld [vmem:[%s1275_s26 + $0x48] sm:$0xff]   ;;  %v1210_v11 = vld [vmem:[%s1275_s26 + $0x50] sm:$0xff]  }
  0x12   : > { %1159 = vmatprep.mubr.msk.bf16.mxu1 %vm334_vm0, %v1208_v8  ;;  %v1203_v12 = vld [vmem:[%s1275_s26 + $0x18] sm:$0xff]   ;;  %v1204_v14 = vld [vmem:[%s1275_s26 + $0x20] sm:$0xff]   ;;  %v1205_v16 = vld [vmem:[%s1275_s26 + $0x28] sm:$0xff]  }
  0x13   : > { %1140 = vmatpush3.bf16.msra.mxu0 %v1198_v3  ;;  %1183 = vmatpush3.bf16.msra.mxu1 %v1198_v3  ;;  %v1211_v13 = vld [vmem:[%s1275_s26 + $0x58] sm:$0xff]   ;;  %v1212_v15 = vld [vmem:[%s1275_s26 + $0x60] sm:$0xff]   ;;  %v1213_v17 = vld [vmem:[%s1275_s26 + $0x68] sm:$0xff]  }
  0x14   : > { %1185 = vmatprep.subr.msk.bf16.mxu0 %vm383_vm1, %v1199_v5  ;;  %1186 = vmatprep.subr.msk.bf16.mxu1 %vm383_vm1, %v1199_v5  ;;  %v1206_v18 = vld [vmem:[%s1275_s26 + $0x30] sm:$0xff]   ;;  %v1207_v20 = vld [vmem:[%s1275_s26 + $0x38] sm:$0xff]  }
  0x15   : > { %v1214_v19 = vld [vmem:[%s1275_s26 + $0x70] sm:$0xff]   ;;  %v1215_v21 = vld [vmem:[%s1275_s26 + $0x78] sm:$0xff]  }
  0x17   : > { %1142 = vmatpush3.bf16.msra.mxu0 %v385_v6  ;;  %1184 = vmatpush3.bf16.msra.mxu1 %v385_v6 }
  0x1a   : > { %1144 = vmatmul.mubr.msk.bf16.vlgmr.msra.gmra.mrb[0].mxu0 %vm334_vm0, %v1201_v7  ;;  %1160 = vmatmul.mubr.msk.bf16.vlgmr.msra.gmra.mrb[0].mxu1 %vm334_vm0, %v1209_v10 }
  0x1b   : > { %1147 = vmatprep.mubr.msk.bf16.mxu0 %vm334_vm0, %v1202_v9  ;;  %1163 = vmatprep.mubr.msk.bf16.mxu1 %vm334_vm0, %v1210_v11 }
  0x22   : > { %1148 = vmatmul.mubr.msk.bf16.gmra.mrb[4].mxu0 %vm334_vm0, %v1203_v12  ;;  %1164 = vmatmul.mubr.msk.bf16.gmra.mrb[4].mxu1 %vm334_vm0, %v1211_v13 }
  0x23   : > { %1151 = vmatprep.mubr.msk.bf16.mxu0 %vm334_vm0, %v1204_v14  ;;  %1167 = vmatprep.mubr.msk.bf16.mxu1 %vm334_vm0, %v1212_v15 }
  0x2a   : > { %1152 = vmatmul.mubr.msk.bf16.gmra.mrb[8].mxu0 %vm334_vm0, %v1205_v16  ;;  %1168 = vmatmul.mubr.msk.bf16.gmra.mrb[8].mxu1 %vm334_vm0, %v1213_v17 }
  0x2b   : > { %1155 = vmatprep.mubr.msk.bf16.mxu0 %vm334_vm0, %v1206_v18  ;;  %1171 = vmatprep.mubr.msk.bf16.mxu1 %vm334_vm0, %v1214_v19 }
  0x32   : > { %1156 = vmatmul.mubr.msk.bf16.gmra.mrb[12].mxu0 %vm334_vm0, %v1207_v20  ;;  %1172 = vmatmul.mubr.msk.bf16.gmra.mrb[12].mxu1 %vm334_vm0, %v1215_v21 }
  0xed   : > { %v1145_v22 = vpop.f32.mrb[0].mxu0  ;;  %v1312_v23 = vpop.f32.mrb[0].mxu1 }
  0xee   : > { %v421_v24 = vpop.f32.mrb[1].mxu0  ;;  %v1314_v25 = vpop.f32.mrb[1].mxu1  ;;  %v747_v37 = vmul.f32 %v1145_v22, %v1145_v22 }
  0xef   : > { %v1146_v26 = vpop.f32.mrb[2].mxu0  ;;  %v1323_v27 = vpop.f32.mrb[2].mxu1  ;;  %v745_v28 = vmul.f32 %v421_v24, %v421_v24 }
  0xf0   : > { %v1025_v29 = vpack.c.bf16 %v1146_v26, %v1145_v22  ;;  %v424_v30 = vpop.f32.mrb[3].mxu0  ;;  %v1065_v31 = vpack.c.bf16 %v1323_v27, %v1312_v23  ;;  %v1327_v32 = vpop.f32.mrb[3].mxu1  ;;  %v748_v40 = vmul.f32 %v1146_v26, %v1146_v26 }
  0xf1   : > { %v1020_v33 = vpack.c.bf16 %v424_v30, %v421_v24  ;;  %v708_v34 = vadd.f32 %v424_v30, %v421_v24  ;;  %v746_v35 = vmul.f32 %v424_v30, %v424_v30  ;;  %v1060_v36 = vpack.c.bf16 %v1327_v32, %v1314_v25 }
  0xf2   : > { %1097 = vst [vmem:[%s1321_s4 + $0x8] sm:$0xff] %v1025_v29   ;;  %1105 = vst [vmem:[%s1321_s4 + $0x48] sm:$0xff] %v1065_v31  }
  0xf3   : > { %1021 = vst [vmem:[%s1321_s4] sm:$0xff] %v1020_v33   ;;  %v709_v38 = vadd.f32 %v1145_v22, %v708_v34  ;;  %v777_v39 = vadd.f32 %v746_v35, %v745_v28  ;;  %1104 = vst [vmem:[%s1321_s4 + $0x40] sm:$0xff] %v1060_v36  }
  0xf5   : > { %v778_v41 = vadd.f32 %v777_v39, %v747_v37  ;;  %v1149_v42 = vpop.f32.mrb[4].mxu0  ;;  %v710_v43 = vadd.f32 %v1146_v26, %v709_v38  ;;  %v1335_v44 = vpop.f32.mrb[4].mxu1 }
  0xf6   : > { %v437_v45 = vpop.f32.mrb[5].mxu0  ;;  %v1337_v46 = vpop.f32.mrb[5].mxu1  ;;  %v751_v61 = vmul.f32 %v1149_v42, %v1149_v42 }
  0xf7   : > { %v711_v47 = vadd.f32 %v710_v43, %v437_v45  ;;  %v749_v48 = vmul.f32 %v437_v45, %v437_v45  ;;  %v779_v49 = vadd.f32 %v778_v41, %v748_v40  ;;  %v1150_v50 = vpop.f32.mrb[6].mxu0  ;;  %v1339_v51 = vpop.f32.mrb[6].mxu1 }
  0xf8   : > { %v1035_v52 = vpack.c.bf16 %v1150_v50, %v1149_v42  ;;  %v440_v53 = vpop.f32.mrb[7].mxu0  ;;  %v1075_v54 = vpack.c.bf16 %v1339_v51, %v1335_v44  ;;  %v1343_v55 = vpop.f32.mrb[7].mxu1  ;;  %v752_v0 = vmul.f32 %v1150_v50, %v1150_v50 }
  0xf9   : > { %v780_v56 = vadd.f32 %v779_v49, %v749_v48  ;;  %v1030_v57 = vpack.c.bf16 %v440_v53, %v437_v45  ;;  %v712_v58 = vadd.f32 %v711_v47, %v440_v53  ;;  %v750_v59 = vmul.f32 %v440_v53, %v440_v53 }
  0xfa   : > { %1099 = vst [vmem:[%s1321_s4 + $0x18] sm:$0xff] %v1035_v52   ;;  %1107 = vst [vmem:[%s1321_s4 + $0x58] sm:$0xff] %v1075_v54   ;;  %v1070_v60 = vpack.c.bf16 %v1343_v55, %v1337_v46 }
  0xfb   : > { %1098 = vst [vmem:[%s1321_s4 + $0x10] sm:$0xff] %v1030_v57   ;;  %v713_v62 = vadd.f32 %v1149_v42, %v712_v58  ;;  %v781_v63 = vadd.f32 %v780_v56, %v750_v59  ;;  %v761_v59 = vmul.f32 %v1314_v25, %v1314_v25 }
  0xfc   : > { %1106 = vst [vmem:[%s1321_s4 + $0x50] sm:$0xff] %v1070_v60  }
  0xfd   : > { %v782_v1 = vadd.f32 %v781_v63, %v751_v61  ;;  %v1153_v2 = vpop.f32.mrb[8].mxu0  ;;  %v714_v3 = vadd.f32 %v1150_v50, %v713_v62  ;;  %v1351_v4 = vpop.f32.mrb[8].mxu1 }
  0xfe   : > { %v453_v5 = vpop.f32.mrb[9].mxu0  ;;  %v1353_v6 = vpop.f32.mrb[9].mxu1  ;;  %v755_v21 = vmul.f32 %v1153_v2, %v1153_v2 }
  0xff   : > { %v715_v7 = vadd.f32 %v714_v3, %v453_v5  ;;  %v753_v8 = vmul.f32 %v453_v5, %v453_v5  ;;  %v783_v9 = vadd.f32 %v782_v1, %v752_v0  ;;  %v1154_v10 = vpop.f32.mrb[10].mxu0  ;;  %v1355_v11 = vpop.f32.mrb[10].mxu1  ;;  %v762_v0 = vmul.f32 %v1327_v32, %v1327_v32 }
 0x100   : > { %v1045_v12 = vpack.c.bf16 %v1154_v10, %v1153_v2  ;;  %v456_v13 = vpop.f32.mrb[11].mxu0  ;;  %v1085_v14 = vpack.c.bf16 %v1355_v11, %v1351_v4  ;;  %v1359_v15 = vpop.f32.mrb[11].mxu1  ;;  %v756_v26 = vmul.f32 %v1154_v10, %v1154_v10  ;;  %v763_v1 = vmul.f32 %v1312_v23, %v1312_v23 }
 0x101   : > { %v784_v16 = vadd.f32 %v783_v9, %v753_v8  ;;  %v1040_v17 = vpack.c.bf16 %v456_v13, %v453_v5  ;;  %v716_v18 = vadd.f32 %v715_v7, %v456_v13  ;;  %v754_v19 = vmul.f32 %v456_v13, %v456_v13 }
 0x102   : > { %1101 = vst [vmem:[%s1321_s4 + $0x28] sm:$0xff] %v1045_v12   ;;  %1109 = vst [vmem:[%s1321_s4 + $0x68] sm:$0xff] %v1085_v14   ;;  %v1080_v20 = vpack.c.bf16 %v1359_v15, %v1353_v6  ;;  %v764_v5 = vmul.f32 %v1323_v27, %v1323_v27  ;;  %v766_v13 = vmul.f32 %v1343_v55, %v1343_v55 }
 0x103   : > { %1100 = vst [vmem:[%s1321_s4 + $0x20] sm:$0xff] %v1040_v17   ;;  %v717_v22 = vadd.f32 %v1153_v2, %v716_v18  ;;  %v785_v24 = vadd.f32 %v784_v16, %v754_v19 }
 0x104   : > { %1108 = vst [vmem:[%s1321_s4 + $0x60] sm:$0xff] %v1080_v20  }
 0x105   : > { %v786_v28 = vadd.f32 %v785_v24, %v755_v21  ;;  %v1157_v29 = vpop.f32.mrb[12].mxu0  ;;  %v718_v30 = vadd.f32 %v1154_v10, %v717_v22  ;;  %v1367_v31 = vpop.f32.mrb[12].mxu1  ;;  %v770_v22 = vmul.f32 %v1359_v15, %v1359_v15 }
 0x106   : > { %v469_v33 = vpop.f32.mrb[13].mxu0  ;;  %v533_v34 = vpop.f32.mrb[13].mxu1  ;;  %v759_v52 = vmul.f32 %v1157_v29, %v1157_v29 }
 0x107   : > { %v719_v35 = vadd.f32 %v718_v30, %v469_v33  ;;  %v757_v36 = vmul.f32 %v469_v33, %v469_v33  ;;  %v787_v37 = vadd.f32 %v786_v28, %v756_v26  ;;  %v1158_v38 = vpop.f32.mrb[14].mxu0  ;;  %v1369_v39 = vpop.f32.mrb[14].mxu1 }
 0x108   : > { %v1055_v40 = vpack.c.bf16 %v1158_v38, %v1157_v29  ;;  %v472_v41 = vpop.f32.mrb[15].mxu0  ;;  %v1095_v42 = vpack.c.bf16 %v1369_v39, %v1367_v31  ;;  %v536_v43 = vpop.f32.mrb[15].mxu1  ;;  %v760_v56 = vmul.f32 %v1158_v38, %v1158_v38 }
 0x109   : > { %v788_v45 = vadd.f32 %v787_v37, %v757_v36  ;;  %v1050_v47 = vpack.c.bf16 %v472_v41, %v469_v33  ;;  %v720_v48 = vadd.f32 %v719_v35, %v472_v41  ;;  %v758_v49 = vmul.f32 %v472_v41, %v472_v41 }
 0x10a   : > { %1103 = vst [vmem:[%s1321_s4 + $0x38] sm:$0xff] %v1055_v40   ;;  %1111 = vst [vmem:[%s1321_s4 + $0x78] sm:$0xff] %v1095_v42   ;;  %v1090_v50 = vpack.c.bf16 %v536_v43, %v533_v34  ;;  %v775_v37 = vmul.f32 %v1367_v31, %v1367_v31  ;;  %v776_v40 = vmul.f32 %v1369_v39, %v1369_v39 }
 0x10b   : > { %1102 = vst [vmem:[%s1321_s4 + $0x30] sm:$0xff] %v1050_v47   ;;  %v721_v53 = vadd.f32 %v1157_v29, %v720_v48  ;;  %v789_v54 = vadd.f32 %v788_v45, %v758_v49  ;;  %v773_v29 = vmul.f32 %v533_v34, %v533_v34 }
 0x10c   : > { %1110 = vst [vmem:[%s1321_s4 + $0x70] sm:$0xff] %v1090_v50  }
 0x10d   : > { %v790_v57 = vadd.f32 %v789_v54, %v759_v52  ;;  %v722_v58 = vadd.f32 %v1158_v38, %v721_v53 }
 0x10f   : > { %v723_v60 = vadd.f32 %v722_v58, %v1314_v25  ;;  %v791_v61 = vadd.f32 %v790_v57, %v760_v56  ;;  %v765_v25 = vmul.f32 %v1337_v46, %v1337_v46 }
 0x111   : > { %v792_v62 = vadd.f32 %v791_v61, %v761_v59  ;;  %v724_v63 = vadd.f32 %v723_v60, %v1327_v32 }
 0x113   : > { %v725_v2 = vadd.f32 %v1312_v23, %v724_v63  ;;  %v793_v3 = vadd.f32 %v792_v62, %v762_v0  ;;  %v767_v23 = vmul.f32 %v1335_v44, %v1335_v44 }
 0x115   : > { %v794_v7 = vadd.f32 %v793_v3, %v763_v1  ;;  %v726_v8 = vadd.f32 %v1323_v27, %v725_v2  ;;  %v768_v27 = vmul.f32 %v1339_v51, %v1339_v51 }
 0x117   : > { %v727_v9 = vadd.f32 %v726_v8, %v1337_v46  ;;  %v795_v10 = vadd.f32 %v794_v7, %v764_v5  ;;  %v769_v46 = vmul.f32 %v1353_v6, %v1353_v6 }
 0x119   : > { %v796_v12 = vadd.f32 %v795_v10, %v765_v25  ;;  %v728_v32 = vadd.f32 %v727_v9, %v1343_v55 }
 0x11b   : > { %v729_v14 = vadd.f32 %v1335_v44, %v728_v32  ;;  %v797_v16 = vadd.f32 %v796_v12, %v766_v13  ;;  %v771_v44 = vmul.f32 %v1351_v4, %v1351_v4 }
 0x11d   : > { %v798_v17 = vadd.f32 %v797_v16, %v767_v23  ;;  %v730_v18 = vadd.f32 %v1339_v51, %v729_v14  ;;  %v772_v51 = vmul.f32 %v1355_v11, %v1355_v11 }
 0x11f   : > { %v731_v19 = vadd.f32 %v730_v18, %v1353_v6  ;;  %v799_v20 = vadd.f32 %v798_v17, %v768_v27 }
 0x121   : > { %v800_v21 = vadd.f32 %v799_v20, %v769_v46  ;;  %v732_v55 = vadd.f32 %v731_v19, %v1359_v15  ;;  %v774_v15 = vmul.f32 %v536_v43, %v536_v43 }
 0x123   : > { %v733_v24 = vadd.f32 %v1351_v4, %v732_v55  ;;  %v801_v26 = vadd.f32 %v800_v21, %v770_v22 }
 0x125   : > { %v802_v28 = vadd.f32 %v801_v26, %v771_v44  ;;  %v734_v6 = vadd.f32 %v1355_v11, %v733_v24 }
 0x127   : > { %v735_v30 = vadd.f32 %v734_v6, %v533_v34  ;;  %v803_v33 = vadd.f32 %v802_v28, %v772_v51 }
 0x129   : > { %v804_v35 = vadd.f32 %v803_v33, %v773_v29  ;;  %v736_v36 = vadd.f32 %v735_v30, %v536_v43 }
 0x12b   : > { %v737_v4 = vadd.f32 %v1367_v31, %v736_v36  ;;  %v805_v38 = vadd.f32 %v804_v35, %v774_v15 }
 0x12d   : > { %v738_v41 = vadd.f32 %v1369_v39, %v737_v4  ;;  %v806_v42 = vadd.f32 %v805_v38, %v775_v37 }
 0x12f   : > { %v739_v11 = vrot.slane %v738_v41, 4  ;;  %v807_v45 = vadd.f32 %v806_v42, %v776_v40 }
 0x131   : > { %v740_v34 = vadd.f32 %v739_v11, %v738_v41  ;;  %v808_v47 = vrot.slane %v807_v45, 4 }
 0x133   : > { %v741_v48 = vrot.slane %v740_v34, 2  ;;  %v809_v49 = vadd.f32 %v808_v47, %v807_v45 }
 0x135   : > { %v742_v43 = vadd.f32 %v741_v48, %v740_v34  ;;  %v810_v50 = vrot.slane %v809_v49, 2 }
 0x137   : > { %v743_v52 = vrot.slane %v742_v43, 1  ;;  %v811_v53 = vadd.f32 %v810_v50, %v809_v49 }
 0x139   : > { %v812_v31 = vrot.slane %v811_v53, 1  ;;  %v744_v39 = vadd.f32 %v743_v52, %v742_v43 }
 0x13b   : > { %v813_v54 = vadd.f32 %v812_v31, %v811_v53 }
 0x13d   : > { %v815_v56 = vsel %vm814_vm2, %v744_v39, %v813_v54 }
 0x13e   : > { %816 = vst [vmem:[%s184_s8] sm:$0x3] %v815_v56 }
 0x13f PF: > { %s14_s12 = sadd.s32 1, %s1222_s12  }
 0x140   : > { %p11_p5 = scmp.ge.s32.totalorder %s14_s12, 4  }
 0x142   :  { %13 = sbr.rel (!%p11_p5) target bundleno = 1 (0x1), region = 70 }

// kernel: basic_block_forward.6
= control target key start
LH: loop header
LB: loop body
LE: loop exit
PB: predicated region body
PF: predicated region fallthrough
CT: control target
= control target key end

     0   :  { %s1179_s12 = smov 0   ;;  %s1326_s0 = inlined_call_operand.vmem [shape: bf16[512,4], index: 0, kind: input, shape index: {}]   ;;  %s1327_s1 = inlined_call_operand.vmem [shape: bf16[4,128], index: 1, kind: input, shape index: {}]   ;;  %s1328_s2 = inlined_call_operand.vmem [shape: bf16[512,128], index: 2, kind: output, shape index: {0}]   ;;  %s1329_s3 = inlined_call_operand.vmem [shape: f32[2,2,128], index: 3, kind: output, shape index: {1}]  }
   0x1 LB: > { %s1185_s13 = sadd.s32 4294967295, %s1157_s12   ;;  %p873_p0 = scmp.ge.s32.totalorder %s1157_s12, 1  ;;  %s1157_s12 = sphi %s1179_s12, %s14_s12  }
   0x2   : > { %p141_p1 = scmp.lt.s32.totalorder %s1157_s12, 3 }
   0x4   : > { %p142_p2 = pnand %p873_p0, %p141_p1 }
   0x5   : > { %v218_v0 = vld [vmem:[%s1327_s1] sm:$0x3] (!%p142_p2)  ;;  %vm348_vm0 = vcmask (!%p142_p2), 1041408   ;;  %s874_s16 = sshll.u32 (!%p142_p2), %s1185_s13, 5  ;;  %vm299_vm1 = vcmask (!%p142_p2), 31744   ;;  %p181_p4 = scmp.lt.s32.totalorder (!%p142_p2), %s1185_s13, 1 }
   0x6   : > { %145 = sbr.rel (%p142_p2) target bundleno = 311 (0x137), region = 28  ;;  %1125 = vmatprep.subr.msk.bf16.mxu0 (!%p142_p2), %vm348_vm0, %v218_v0  ;;  %v350_v1 = vsel (!%p142_p2), %vm348_vm0, %v218_v0, 0  ;;  %p170_p3 = scmp.lt.s32.totalorder (!%p142_p2), %s874_s16, 63  ;;  %1126 = vmatprep.subr.msk.bf16.mxu1 (!%p142_p2), %vm348_vm0, %v218_v0  ;;  %vm779_vm2 = vcmask (!%p142_p2), 1040384  }
   0x7   : > { %1090 = vmatpush3.bf16.msra.mxu0 (!%p142_p2), %v350_v1  ;;  %1124 = vmatpush3.bf16.msra.mxu1 (!%p142_p2), %v350_v1 }
   0xd   : > { %s1331_s16 = smov (!%p170_p3, %s874_s16), 63  ;;  %s1333_s13 = smov (!%p181_p4, %s1185_s13), 1 }
   0xe   : > { %s875_s17 = sshll.u32 %s1331_s16, 2  ;;  %s878_s24 = sshll.u32 %s1333_s13, 1 }
   0xf   : > { %s1201_s20 = scalar_lea.vmem %s1326_s0, %s875_s17  ;;  %s1240_s23 = scalar_lea.vmem %s1328_s2, %s875_s17 }
  0x10   : > { %v1135_v2 = vld [vmem:[%s1201_s20] sm:$0xff]   ;;  %v1136_v3 = vld [vmem:[%s1201_s20 + $0x8] sm:$0xff]   ;;  %v1137_v4 = vld [vmem:[%s1201_s20 + $0x10] sm:$0xff]   ;;  %s184_s27 = scalar_lea.vmem %s1329_s3, %s878_s24 }
  0x11   : > { %1091 = vmatprep.mubr.msk.bf16.mxu0 %vm299_vm1, %v1135_v2  ;;  %v1138_v5 = vld [vmem:[%s1201_s20 + $0x18] sm:$0xff]   ;;  %v1139_v6 = vld [vmem:[%s1201_s20 + $0x20] sm:$0xff]   ;;  %v1144_v8 = vld [vmem:[%s1201_s20 + $0x48] sm:$0xff]  }
  0x12   : > { %1092 = vmatmul.mubr.msk.bf16.vlgmr.msra.gmra.mrb[0].mxu0 %vm299_vm1, %v1136_v3  ;;  %v1143_v7 = vld [vmem:[%s1201_s20 + $0x40] sm:$0xff]   ;;  %v1145_v9 = vld [vmem:[%s1201_s20 + $0x50] sm:$0xff]   ;;  %v1140_v10 = vld [vmem:[%s1201_s20 + $0x28] sm:$0xff]  }
  0x13   : > { %1095 = vmatprep.mubr.msk.bf16.mxu0 %vm299_vm1, %v1137_v4  ;;  %1107 = vmatprep.mubr.msk.bf16.mxu1 %vm299_vm1, %v1143_v7  ;;  %v1146_v11 = vld [vmem:[%s1201_s20 + $0x58] sm:$0xff]   ;;  %v1141_v12 = vld [vmem:[%s1201_s20 + $0x30] sm:$0xff]   ;;  %v1147_v13 = vld [vmem:[%s1201_s20 + $0x60] sm:$0xff]  }
  0x14   : > { %1108 = vmatmul.mubr.msk.bf16.vlgmr.msra.gmra.mrb[0].mxu1 %vm299_vm1, %v1144_v8  ;;  %v1142_v14 = vld [vmem:[%s1201_s20 + $0x38] sm:$0xff]   ;;  %v1148_v15 = vld [vmem:[%s1201_s20 + $0x68] sm:$0xff]   ;;  %v1149_v16 = vld [vmem:[%s1201_s20 + $0x70] sm:$0xff]  }
  0x15   : > { %1111 = vmatprep.mubr.msk.bf16.mxu1 %vm299_vm1, %v1145_v9  ;;  %v1150_v17 = vld [vmem:[%s1201_s20 + $0x78] sm:$0xff]  }
  0x1a   : > { %1096 = vmatmul.mubr.msk.bf16.gmra.mrb[4].mxu0 %vm299_vm1, %v1138_v5 }
  0x1b   : > { %1099 = vmatprep.mubr.msk.bf16.mxu0 %vm299_vm1, %v1139_v6 }
  0x1c   : > { %1112 = vmatmul.mubr.msk.bf16.gmra.mrb[4].mxu1 %vm299_vm1, %v1146_v11 }
  0x1d   : > { %1115 = vmatprep.mubr.msk.bf16.mxu1 %vm299_vm1, %v1147_v13 }
  0x22   : > { %1100 = vmatmul.mubr.msk.bf16.gmra.mrb[8].mxu0 %vm299_vm1, %v1140_v10 }
  0x23   : > { %1103 = vmatprep.mubr.msk.bf16.mxu0 %vm299_vm1, %v1141_v12 }
  0x24   : > { %1116 = vmatmul.mubr.msk.bf16.gmra.mrb[8].mxu1 %vm299_vm1, %v1148_v15 }
  0x25   : > { %1119 = vmatprep.mubr.msk.bf16.mxu1 %vm299_vm1, %v1149_v16 }
  0x2a   : > { %1104 = vmatmul.mubr.msk.bf16.gmra.mrb[12].mxu0 %vm299_vm1, %v1142_v14 }
  0x2c   : > { %1120 = vmatmul.mubr.msk.bf16.gmra.mrb[12].mxu1 %vm299_vm1, %v1150_v17 }
  0xe5   : > { %v1093_v18 = vpop.f32.mrb[0].mxu0 }
  0xe6   : > { %v386_v19 = vpop.f32.mrb[1].mxu0  ;;  %v712_v27 = vmul.f32 %v1093_v18, %v1093_v18 }
  0xe7   : > { %v1094_v20 = vpop.f32.mrb[2].mxu0  ;;  %v710_v23 = vmul.f32 %v386_v19, %v386_v19  ;;  %v1244_v34 = vpop.f32.mrb[0].mxu1 }
  0xe8   : > { %v985_v21 = vpack.c.bf16 %v1094_v20, %v1093_v18  ;;  %v389_v22 = vpop.f32.mrb[3].mxu0  ;;  %v713_v30 = vmul.f32 %v1094_v20, %v1094_v20  ;;  %v1246_v36 = vpop.f32.mrb[1].mxu1 }
  0xe9   : > { %v980_v24 = vpack.c.bf16 %v389_v22, %v386_v19  ;;  %v673_v25 = vadd.f32 %v389_v22, %v386_v19  ;;  %v711_v26 = vmul.f32 %v389_v22, %v389_v22  ;;  %v1248_v41 = vpop.f32.mrb[2].mxu1 }
  0xea   : > { %1057 = vst [vmem:[%s1240_s23 + $0x8] sm:$0xff] %v985_v21   ;;  %v1025_v44 = vpack.c.bf16 %v1248_v41, %v1244_v34  ;;  %v1252_v45 = vpop.f32.mrb[3].mxu1 }
  0xeb   : > { %981 = vst [vmem:[%s1240_s23] sm:$0xff] %v980_v24   ;;  %v674_v28 = vadd.f32 %v1093_v18, %v673_v25  ;;  %v742_v29 = vadd.f32 %v711_v26, %v710_v23  ;;  %v1020_v50 = vpack.c.bf16 %v1252_v45, %v1246_v36 }
  0xec   : > { %1065 = vst [vmem:[%s1240_s23 + $0x48] sm:$0xff] %v1025_v44   ;;  %v726_v44 = vmul.f32 %v1246_v36, %v1246_v36 }
  0xed   : > { %v743_v31 = vadd.f32 %v742_v29, %v712_v27  ;;  %v1097_v32 = vpop.f32.mrb[4].mxu0  ;;  %v675_v33 = vadd.f32 %v1094_v20, %v674_v28  ;;  %1064 = vst [vmem:[%s1240_s23 + $0x40] sm:$0xff] %v1020_v50  }
  0xee   : > { %v402_v35 = vpop.f32.mrb[5].mxu0  ;;  %v716_v51 = vmul.f32 %v1097_v32, %v1097_v32 }
  0xef   : > { %v676_v37 = vadd.f32 %v675_v33, %v402_v35  ;;  %v714_v38 = vmul.f32 %v402_v35, %v402_v35  ;;  %v744_v39 = vadd.f32 %v743_v31, %v713_v30  ;;  %v1098_v40 = vpop.f32.mrb[6].mxu0  ;;  %v1260_v58 = vpop.f32.mrb[4].mxu1 }
  0xf0   : > { %v995_v42 = vpack.c.bf16 %v1098_v40, %v1097_v32  ;;  %v405_v43 = vpop.f32.mrb[7].mxu0  ;;  %v717_v54 = vmul.f32 %v1098_v40, %v1098_v40  ;;  %v1262_v60 = vpop.f32.mrb[5].mxu1 }
  0xf1   : > { %v745_v46 = vadd.f32 %v744_v39, %v714_v38  ;;  %v990_v47 = vpack.c.bf16 %v405_v43, %v402_v35  ;;  %v677_v48 = vadd.f32 %v676_v37, %v405_v43  ;;  %v715_v49 = vmul.f32 %v405_v43, %v405_v43  ;;  %v1264_v1 = vpop.f32.mrb[6].mxu1 }
  0xf2   : > { %1059 = vst [vmem:[%s1240_s23 + $0x18] sm:$0xff] %v995_v42   ;;  %v1035_v4 = vpack.c.bf16 %v1264_v1, %v1260_v58  ;;  %v1268_v5 = vpop.f32.mrb[7].mxu1 }
  0xf3   : > { %1058 = vst [vmem:[%s1240_s23 + $0x10] sm:$0xff] %v990_v47   ;;  %v678_v52 = vadd.f32 %v1097_v32, %v677_v48  ;;  %v746_v53 = vadd.f32 %v745_v46, %v715_v49  ;;  %v1030_v10 = vpack.c.bf16 %v1268_v5, %v1262_v60 }
  0xf4   : > { %1067 = vst [vmem:[%s1240_s23 + $0x58] sm:$0xff] %v1035_v4  }
  0xf5   : > { %v747_v55 = vadd.f32 %v746_v53, %v716_v51  ;;  %v1101_v56 = vpop.f32.mrb[8].mxu0  ;;  %v679_v57 = vadd.f32 %v1098_v40, %v678_v52  ;;  %1066 = vst [vmem:[%s1240_s23 + $0x50] sm:$0xff] %v1030_v10  }
  0xf6   : > { %v418_v59 = vpop.f32.mrb[9].mxu0  ;;  %v720_v11 = vmul.f32 %v1101_v56, %v1101_v56 }
  0xf7   : > { %v680_v61 = vadd.f32 %v679_v57, %v418_v59  ;;  %v718_v62 = vmul.f32 %v418_v59, %v418_v59  ;;  %v748_v63 = vadd.f32 %v747_v55, %v717_v54  ;;  %v1102_v0 = vpop.f32.mrb[10].mxu0  ;;  %v1276_v18 = vpop.f32.mrb[8].mxu1  ;;  %v727_v55 = vmul.f32 %v1252_v45, %v1252_v45 }
  0xf8   : > { %v1005_v2 = vpack.c.bf16 %v1102_v0, %v1101_v56  ;;  %v421_v3 = vpop.f32.mrb[11].mxu0  ;;  %v721_v14 = vmul.f32 %v1102_v0, %v1102_v0  ;;  %v482_v20 = vpop.f32.mrb[9].mxu1  ;;  %v728_v57 = vmul.f32 %v1244_v34, %v1244_v34 }
  0xf9   : > { %v749_v6 = vadd.f32 %v748_v63, %v718_v62  ;;  %v1000_v7 = vpack.c.bf16 %v421_v3, %v418_v59  ;;  %v681_v8 = vadd.f32 %v680_v61, %v421_v3  ;;  %v719_v9 = vmul.f32 %v421_v3, %v421_v3  ;;  %v1278_v25 = vpop.f32.mrb[10].mxu1 }
  0xfa   : > { %1061 = vst [vmem:[%s1240_s23 + $0x28] sm:$0xff] %v1005_v2   ;;  %v1045_v28 = vpack.c.bf16 %v1278_v25, %v1276_v18  ;;  %v485_v29 = vpop.f32.mrb[11].mxu1 }
  0xfb   : > { %1060 = vst [vmem:[%s1240_s23 + $0x20] sm:$0xff] %v1000_v7   ;;  %v682_v12 = vadd.f32 %v1101_v56, %v681_v8  ;;  %v750_v13 = vadd.f32 %v749_v6, %v719_v9  ;;  %v1040_v35 = vpack.c.bf16 %v485_v29, %v482_v20  ;;  %v732_v6 = vmul.f32 %v1260_v58, %v1260_v58 }
  0xfc   : > { %1069 = vst [vmem:[%s1240_s23 + $0x68] sm:$0xff] %v1045_v28  }
  0xfd   : > { %v751_v15 = vadd.f32 %v750_v13, %v720_v11  ;;  %v1105_v16 = vpop.f32.mrb[12].mxu0  ;;  %v683_v17 = vadd.f32 %v1102_v0, %v682_v12  ;;  %1068 = vst [vmem:[%s1240_s23 + $0x60] sm:$0xff] %v1040_v35   ;;  %v730_v0 = vmul.f32 %v1262_v60, %v1262_v60 }
  0xfe   : > { %v434_v19 = vpop.f32.mrb[13].mxu0  ;;  %v724_v37 = vmul.f32 %v1105_v16, %v1105_v16 }
  0xff   : > { %v684_v21 = vadd.f32 %v683_v17, %v434_v19  ;;  %v722_v22 = vmul.f32 %v434_v19, %v434_v19  ;;  %v752_v23 = vadd.f32 %v751_v15, %v721_v14  ;;  %v1106_v24 = vpop.f32.mrb[14].mxu0  ;;  %v1121_v46 = vpop.f32.mrb[12].mxu1  ;;  %v735_v15 = vmul.f32 %v485_v29, %v485_v29 }
 0x100   : > { %v1015_v26 = vpack.c.bf16 %v1106_v24, %v1105_v16  ;;  %v437_v27 = vpop.f32.mrb[15].mxu0  ;;  %v725_v40 = vmul.f32 %v1106_v24, %v1106_v24  ;;  %v498_v47 = vpop.f32.mrb[13].mxu1 }
 0x101   : > { %v753_v30 = vadd.f32 %v752_v23, %v722_v22  ;;  %v1010_v31 = vpack.c.bf16 %v437_v27, %v434_v19  ;;  %v685_v32 = vadd.f32 %v684_v21, %v437_v27  ;;  %v723_v33 = vmul.f32 %v437_v27, %v437_v27  ;;  %v1122_v50 = vpop.f32.mrb[14].mxu1 }
 0x102   : > { %1063 = vst [vmem:[%s1240_s23 + $0x38] sm:$0xff] %v1015_v26   ;;  %v1055_v51 = vpack.c.bf16 %v1122_v50, %v1121_v46  ;;  %v501_v52 = vpop.f32.mrb[15].mxu1  ;;  %v740_v27 = vmul.f32 %v1121_v46, %v1121_v46 }
 0x103   : > { %1062 = vst [vmem:[%s1240_s23 + $0x30] sm:$0xff] %v1010_v31   ;;  %v686_v38 = vadd.f32 %v1105_v16, %v685_v32  ;;  %v754_v39 = vadd.f32 %v753_v30, %v723_v33  ;;  %v1050_v56 = vpack.c.bf16 %v501_v52, %v498_v47  ;;  %v739_v26 = vmul.f32 %v501_v52, %v501_v52 }
 0x104   : > { %1071 = vst [vmem:[%s1240_s23 + $0x78] sm:$0xff] %v1055_v51   ;;  %v741_v30 = vmul.f32 %v1122_v50, %v1122_v50 }
 0x105   : > { %v755_v42 = vadd.f32 %v754_v39, %v724_v37  ;;  %v687_v43 = vadd.f32 %v1106_v24, %v686_v38  ;;  %1070 = vst [vmem:[%s1240_s23 + $0x70] sm:$0xff] %v1050_v56  }
 0x107   : > { %v688_v48 = vadd.f32 %v687_v43, %v1246_v36  ;;  %v756_v49 = vadd.f32 %v755_v42, %v725_v40  ;;  %v729_v36 = vmul.f32 %v1248_v41, %v1248_v41 }
 0x109   : > { %v757_v53 = vadd.f32 %v756_v49, %v726_v44  ;;  %v689_v54 = vadd.f32 %v688_v48, %v1252_v45 }
 0x10b   : > { %v690_v59 = vadd.f32 %v1244_v34, %v689_v54  ;;  %v758_v61 = vadd.f32 %v757_v53, %v727_v55  ;;  %v731_v34 = vmul.f32 %v1268_v5, %v1268_v5 }
 0x10d   : > { %v759_v62 = vadd.f32 %v758_v61, %v728_v57  ;;  %v691_v63 = vadd.f32 %v1248_v41, %v690_v59  ;;  %v733_v41 = vmul.f32 %v1264_v1, %v1264_v1 }
 0x10f   : > { %v692_v45 = vadd.f32 %v691_v63, %v1262_v60  ;;  %v760_v2 = vadd.f32 %v759_v62, %v729_v36  ;;  %v734_v60 = vmul.f32 %v482_v20, %v482_v20 }
 0x111   : > { %v761_v3 = vadd.f32 %v760_v2, %v730_v0  ;;  %v693_v4 = vadd.f32 %v692_v45, %v1268_v5  ;;  %v736_v5 = vmul.f32 %v1276_v18, %v1276_v18 }
 0x113   : > { %v694_v7 = vadd.f32 %v1260_v58, %v693_v4  ;;  %v762_v8 = vadd.f32 %v761_v3, %v731_v34  ;;  %v737_v58 = vmul.f32 %v1278_v25, %v1278_v25 }
 0x115   : > { %v763_v9 = vadd.f32 %v762_v8, %v732_v6  ;;  %v695_v10 = vadd.f32 %v1264_v1, %v694_v7  ;;  %v738_v1 = vmul.f32 %v498_v47, %v498_v47 }
 0x117   : > { %v696_v11 = vadd.f32 %v695_v10, %v482_v20  ;;  %v764_v12 = vadd.f32 %v763_v9, %v733_v41 }
 0x119   : > { %v765_v13 = vadd.f32 %v764_v12, %v734_v60  ;;  %v697_v14 = vadd.f32 %v696_v11, %v485_v29 }
 0x11b   : > { %v698_v16 = vadd.f32 %v1276_v18, %v697_v14  ;;  %v766_v17 = vadd.f32 %v765_v13, %v735_v15 }
 0x11d   : > { %v767_v19 = vadd.f32 %v766_v17, %v736_v5  ;;  %v699_v21 = vadd.f32 %v1278_v25, %v698_v16 }
 0x11f   : > { %v700_v22 = vadd.f32 %v699_v21, %v498_v47  ;;  %v768_v20 = vadd.f32 %v767_v19, %v737_v58 }
 0x121   : > { %v769_v23 = vadd.f32 %v768_v20, %v738_v1  ;;  %v701_v24 = vadd.f32 %v700_v22, %v501_v52 }
 0x123   : > { %v702_v28 = vadd.f32 %v1121_v46, %v701_v24  ;;  %v770_v29 = vadd.f32 %v769_v23, %v739_v26 }
 0x125   : > { %v703_v18 = vadd.f32 %v1122_v50, %v702_v28  ;;  %v771_v31 = vadd.f32 %v770_v29, %v740_v27 }
 0x127   : > { %v704_v32 = vrot.slane %v703_v18, 4  ;;  %v772_v33 = vadd.f32 %v771_v31, %v741_v30 }
 0x129   : > { %v705_v35 = vadd.f32 %v704_v32, %v703_v18  ;;  %v773_v37 = vrot.slane %v772_v33, 4 }
 0x12b   : > { %v706_v38 = vrot.slane %v705_v35, 2  ;;  %v774_v25 = vadd.f32 %v773_v37, %v772_v33 }
 0x12d   : > { %v707_v39 = vadd.f32 %v706_v38, %v705_v35  ;;  %v775_v40 = vrot.slane %v774_v25, 2 }
 0x12f   : > { %v708_v42 = vrot.slane %v707_v39, 1  ;;  %v776_v43 = vadd.f32 %v775_v40, %v774_v25 }
 0x131   : > { %v777_v44 = vrot.slane %v776_v43, 1  ;;  %v709_v46 = vadd.f32 %v708_v42, %v707_v39 }
 0x133   : > { %v778_v47 = vadd.f32 %v777_v44, %v776_v43 }
 0x135   : > { %v780_v48 = vsel %vm779_vm2, %v709_v46, %v778_v47 }
 0x136   : > { %781 = vst [vmem:[%s184_s27] sm:$0x3] %v780_v48 }
 0x137 PF: > { %s14_s12 = sadd.s32 1, %s1157_s12  }
 0x138   : > { %p11_p5 = scmp.ge.s32.totalorder %s14_s12, 4  }
 0x13a   :  { %13 = sbr.rel (!%p11_p5) target bundleno = 1 (0x1), region = 70 }

// kernel: basic_block_forward.7
= control target key start
LH: loop header
LB: loop body
LE: loop exit
PB: predicated region body
PF: predicated region fallthrough
CT: control target
= control target key end

     0   :  { %s1776_s0 = inlined_call_operand.vmem [shape: bf16[512,128], index: 0, kind: input, shape index: {}]   ;;  %s1777_s1 = inlined_call_operand.vmem [shape: f32[2,128], index: 1, kind: input, shape index: {}]   ;;  %s1778_s2 = inlined_call_operand.vmem [shape: bf16[512,128], index: 2, kind: input, shape index: {}]   ;;  %s1779_s3 = inlined_call_operand.vmem [shape: f32[2,128], index: 3, kind: input, shape index: {}]   ;;  %s1780_s4 = inlined_call_operand.vmem [shape: f32[512,128], index: 4, kind: output, shape index: {}]  }
   0x1   :  { %v750_v0 = vld [vmem:[%s1776_s0] sm:$0xff]   ;;  %v1005_v9 = vld [vmem:[%s1776_s0 + $0x8] sm:$0xff]   ;;  %v1006_v20 = vld [vmem:[%s1776_s0 + $0x10] sm:$0xff]  }
   0x2   :  { %v1102_v1 = vld [vmem:[%s1777_s1] ss:$0 sm:$0xff]  ;;  %v751_v2 = vunpack.c.l.bf16 %v750_v0  ;;  %v752_v5 = vunpack.c.h.bf16 %v750_v0  ;;  %v1115_v6 = vld [vmem:[%s1777_s1 + $0x1] ss:$0 sm:$0xff]  ;;  %v1036_v10 = vld [vmem:[%s1778_s2 + $0x8] sm:$0xff]   ;;  %v755_v14 = vunpack.c.l.bf16 %v1005_v9  ;;  %v756_v18 = vunpack.c.h.bf16 %v1005_v9 }
   0x3   :  { %v878_v3 = vld [vmem:[%s1778_s2] sm:$0xff]   ;;  %v883_v15 = vunpack.c.l.bf16 %v1036_v10  ;;  %v884_v19 = vunpack.c.h.bf16 %v1036_v10  ;;  %v1037_v21 = vld [vmem:[%s1778_s2 + $0x10] sm:$0xff]   ;;  %v759_v32 = vunpack.c.l.bf16 %v1006_v20  ;;  %v760_v41 = vunpack.c.h.bf16 %v1006_v20  ;;  %v1007_v42 = vld [vmem:[%s1776_s0 + $0x18] sm:$0xff]  }
   0x4   :  { %v1110_v4 = vld [vmem:[%s1779_s3] ss:$0 sm:$0xff]  ;;  %v879_v7 = vunpack.c.l.bf16 %v878_v3  ;;  %v880_v8 = vunpack.c.h.bf16 %v878_v3  ;;  %v150_v11 = vmul.f32 %v751_v2, %v1102_v1  ;;  %v1127_v12 = vld [vmem:[%s1779_s3 + $0x1] ss:$0 sm:$0xff]  ;;  %v151_v13 = vmul.f32 %v752_v5, %v1102_v1  ;;  %v1038_v43 = vld [vmem:[%s1778_s2 + $0x18] sm:$0xff]  }
   0x5   :  { %v152_v24 = vmul.f32 %v755_v14, %v1102_v1  ;;  %v418_v25 = vmul.f32 %v883_v15, %v1110_v4  ;;  %v153_v28 = vmul.f32 %v756_v18, %v1102_v1  ;;  %v419_v29 = vmul.f32 %v884_v19, %v1110_v4  ;;  %v1008_v52 = vld [vmem:[%s1776_s0 + $0x20] sm:$0xff]   ;;  %v1009_v14 = vld [vmem:[%s1776_s0 + $0x28] sm:$0xff]  }
   0x6   :  { %v416_v16 = vmul.f32 %v879_v7, %v1110_v4  ;;  %v417_v17 = vmul.f32 %v880_v8, %v1110_v4  ;;  %v219_v22 = vadd.f32 %v1115_v6, %v150_v11  ;;  %v220_v23 = vadd.f32 %v1115_v6, %v151_v13  ;;  %v1039_v57 = vld [vmem:[%s1778_s2 + $0x20] sm:$0xff]   ;;  %v1040_v19 = vld [vmem:[%s1778_s2 + $0x28] sm:$0xff]  }
   0x7   :  { %v221_v30 = vadd.f32 %v1115_v6, %v152_v24  ;;  %v487_v31 = vadd.f32 %v1127_v12, %v418_v25  ;;  %v887_v33 = vunpack.c.l.bf16 %v1037_v21  ;;  %v222_v36 = vadd.f32 %v1115_v6, %v153_v28 }
   0x8   :  { %v485_v26 = vadd.f32 %v1127_v12, %v416_v16  ;;  %v486_v27 = vadd.f32 %v1127_v12, %v417_v17  ;;  %v488_v37 = vadd.f32 %v1127_v12, %v419_v29  ;;  %v154_v39 = vmul.f32 %v759_v32, %v1102_v1  ;;  %v1010_v32 = vld [vmem:[%s1776_s0 + $0x30] sm:$0xff]  }
   0x9   :  { %v551_v38 = vadd.f32 %v487_v31, %v221_v30  ;;  %v420_v40 = vmul.f32 %v887_v33, %v1110_v4  ;;  %v888_v47 = vunpack.c.h.bf16 %v1037_v21  ;;  %v155_v51 = vmul.f32 %v760_v41, %v1102_v1  ;;  %v1041_v33 = vld [vmem:[%s1778_s2 + $0x30] sm:$0xff]  }
   0xa   :  { %v549_v34 = vadd.f32 %v485_v26, %v219_v22  ;;  %v550_v35 = vadd.f32 %v486_v27, %v220_v23  ;;  %v552_v46 = vadd.f32 %v488_v37, %v222_v36  ;;  %v223_v49 = vadd.f32 %v1115_v6, %v154_v39 }
   0xb   :  { %v615_v48 = vmax.f32 %v551_v38, 0.0  ;;  %v489_v50 = vadd.f32 %v1127_v12, %v420_v40  ;;  %v421_v54 = vmul.f32 %v888_v47, %v1110_v4  ;;  %v763_v55 = vunpack.c.l.bf16 %v1007_v42 }
   0xc   :  { %v613_v44 = vmax.f32 %v549_v34, 0.0  ;;  %v614_v45 = vmax.f32 %v550_v35, 0.0  ;;  %v616_v53 = vmax.f32 %v552_v46, 0.0  ;;  %v891_v56 = vunpack.c.l.bf16 %v1038_v43  ;;  %v1011_v46 = vld [vmem:[%s1776_s0 + $0x38] sm:$0xff]  }
   0xd   :  { %679 = vst [vmem:[%s1780_s4 + $0x10] sm:$0xff] %v615_v48  ;;  %v553_v58 = vadd.f32 %v489_v50, %v223_v49  ;;  %v224_v59 = vadd.f32 %v1115_v6, %v155_v51  ;;  %v764_v60 = vunpack.c.h.bf16 %v1007_v42  ;;  %v892_v61 = vunpack.c.h.bf16 %v1038_v43 }
   0xe   :  { %677 = vst [vmem:[%s1780_s4] sm:$0xff] %v613_v44  ;;  %678 = vst [vmem:[%s1780_s4 + $0x8] sm:$0xff] %v614_v45  ;;  %v490_v62 = vadd.f32 %v1127_v12, %v421_v54  ;;  %v156_v63 = vmul.f32 %v763_v55, %v1102_v1  ;;  %v422_v0 = vmul.f32 %v891_v56, %v1110_v4  ;;  %v767_v2 = vunpack.c.l.bf16 %v1008_v52  ;;  %v1042_v55 = vld [vmem:[%s1778_s2 + $0x38] sm:$0xff]  }
   0xf   :  { %680 = vst [vmem:[%s1780_s4 + $0x18] sm:$0xff] %v616_v53  ;;  %v617_v3 = vmax.f32 %v553_v58, 0.0  ;;  %v157_v5 = vmul.f32 %v764_v60, %v1102_v1  ;;  %v423_v7 = vmul.f32 %v892_v61, %v1110_v4  ;;  %v895_v8 = vunpack.c.l.bf16 %v1039_v57 }
  0x10   :  { %v554_v9 = vadd.f32 %v490_v62, %v224_v59  ;;  %v225_v10 = vadd.f32 %v1115_v6, %v156_v63  ;;  %v491_v11 = vadd.f32 %v1127_v12, %v422_v0  ;;  %v158_v13 = vmul.f32 %v767_v2, %v1102_v1 }
  0x11   :  { %681 = vst [vmem:[%s1780_s4 + $0x20] sm:$0xff] %v617_v3  ;;  %v226_v15 = vadd.f32 %v1115_v6, %v157_v5  ;;  %v492_v16 = vadd.f32 %v1127_v12, %v423_v7  ;;  %v424_v17 = vmul.f32 %v895_v8, %v1110_v4  ;;  %v768_v18 = vunpack.c.h.bf16 %v1008_v52  ;;  %v1012_v7 = vld [vmem:[%s1776_s0 + $0x40] sm:$0xff]  }
  0x12   :  { %v618_v20 = vmax.f32 %v554_v9, 0.0  ;;  %v555_v21 = vadd.f32 %v491_v11, %v225_v10  ;;  %v227_v22 = vadd.f32 %v1115_v6, %v158_v13  ;;  %v896_v23 = vunpack.c.h.bf16 %v1039_v57  ;;  %v1043_v13 = vld [vmem:[%s1778_s2 + $0x40] sm:$0xff]  }
  0x13   :  { %v556_v24 = vadd.f32 %v492_v16, %v226_v15  ;;  %v493_v25 = vadd.f32 %v1127_v12, %v424_v17  ;;  %v159_v26 = vmul.f32 %v768_v18, %v1102_v1  ;;  %v771_v27 = vunpack.c.l.bf16 %v1009_v14 }
  0x14   :  { %682 = vst [vmem:[%s1780_s4 + $0x28] sm:$0xff] %v618_v20  ;;  %v619_v28 = vmax.f32 %v555_v21, 0.0  ;;  %v425_v29 = vmul.f32 %v896_v23, %v1110_v4  ;;  %v899_v30 = vunpack.c.l.bf16 %v1040_v19  ;;  %v772_v31 = vunpack.c.h.bf16 %v1009_v14 }
  0x15   :  { %v620_v34 = vmax.f32 %v556_v24, 0.0  ;;  %v557_v35 = vadd.f32 %v493_v25, %v227_v22  ;;  %v228_v36 = vadd.f32 %v1115_v6, %v159_v26  ;;  %v160_v37 = vmul.f32 %v771_v27, %v1102_v1  ;;  %v1013_v26 = vld [vmem:[%s1776_s0 + $0x48] sm:$0xff]  }
  0x16   :  { %683 = vst [vmem:[%s1780_s4 + $0x30] sm:$0xff] %v619_v28  ;;  %v494_v38 = vadd.f32 %v1127_v12, %v425_v29  ;;  %v426_v39 = vmul.f32 %v899_v30, %v1110_v4  ;;  %v161_v40 = vmul.f32 %v772_v31, %v1102_v1  ;;  %v900_v41 = vunpack.c.h.bf16 %v1040_v19  ;;  %v1044_v27 = vld [vmem:[%s1778_s2 + $0x48] sm:$0xff]  }
  0x17   :  { %684 = vst [vmem:[%s1780_s4 + $0x38] sm:$0xff] %v620_v34  ;;  %v621_v42 = vmax.f32 %v557_v35, 0.0  ;;  %v229_v43 = vadd.f32 %v1115_v6, %v160_v37  ;;  %v775_v44 = vunpack.c.l.bf16 %v1010_v32  ;;  %v903_v45 = vunpack.c.l.bf16 %v1041_v33 }
  0x18   :  { %v558_v47 = vadd.f32 %v494_v38, %v228_v36  ;;  %v495_v48 = vadd.f32 %v1127_v12, %v426_v39  ;;  %v230_v49 = vadd.f32 %v1115_v6, %v161_v40  ;;  %v427_v50 = vmul.f32 %v900_v41, %v1110_v4  ;;  %v1014_v40 = vld [vmem:[%s1776_s0 + $0x50] sm:$0xff]  }
  0x19   :  { %685 = vst [vmem:[%s1780_s4 + $0x40] sm:$0xff] %v621_v42  ;;  %v162_v51 = vmul.f32 %v775_v44, %v1102_v1  ;;  %v428_v52 = vmul.f32 %v903_v45, %v1110_v4  ;;  %v776_v53 = vunpack.c.h.bf16 %v1010_v32  ;;  %v904_v54 = vunpack.c.h.bf16 %v1041_v33 }
  0x1a   :  { %v622_v56 = vmax.f32 %v558_v47, 0.0  ;;  %v559_v57 = vadd.f32 %v495_v48, %v229_v43  ;;  %v496_v58 = vadd.f32 %v1127_v12, %v427_v50  ;;  %v779_v59 = vunpack.c.l.bf16 %v1011_v46 }
  0x1b   :  { %v231_v60 = vadd.f32 %v1115_v6, %v162_v51  ;;  %v497_v61 = vadd.f32 %v1127_v12, %v428_v52  ;;  %v163_v62 = vmul.f32 %v776_v53, %v1102_v1  ;;  %v429_v63 = vmul.f32 %v904_v54, %v1110_v4 }
  0x1c   :  { %686 = vst [vmem:[%s1780_s4 + $0x48] sm:$0xff] %v622_v56  ;;  %v623_v0 = vmax.f32 %v559_v57, 0.0  ;;  %v560_v2 = vadd.f32 %v496_v58, %v230_v49  ;;  %v164_v3 = vmul.f32 %v779_v59, %v1102_v1  ;;  %v907_v5 = vunpack.c.l.bf16 %v1042_v55  ;;  %v1045_v49 = vld [vmem:[%s1778_s2 + $0x50] sm:$0xff]  }
  0x1d   :  { %v561_v8 = vadd.f32 %v497_v61, %v231_v60  ;;  %v232_v9 = vadd.f32 %v1115_v6, %v163_v62  ;;  %v498_v10 = vadd.f32 %v1127_v12, %v429_v63  ;;  %v780_v11 = vunpack.c.h.bf16 %v1011_v46  ;;  %v1015_v62 = vld [vmem:[%s1776_s0 + $0x58] sm:$0xff]  }
  0x1e   :  { %687 = vst [vmem:[%s1780_s4 + $0x50] sm:$0xff] %v623_v0  ;;  %v624_v14 = vmax.f32 %v560_v2, 0.0  ;;  %v233_v15 = vadd.f32 %v1115_v6, %v164_v3  ;;  %v430_v16 = vmul.f32 %v907_v5, %v1110_v4  ;;  %v908_v17 = vunpack.c.h.bf16 %v1042_v55  ;;  %v1046_v63 = vld [vmem:[%s1778_s2 + $0x58] sm:$0xff]  }
  0x1f   :  { %v625_v18 = vmax.f32 %v561_v8, 0.0  ;;  %v562_v19 = vadd.f32 %v498_v10, %v232_v9  ;;  %v165_v20 = vmul.f32 %v780_v11, %v1102_v1  ;;  %v783_v21 = vunpack.c.l.bf16 %v1012_v7 }
  0x20   :  { %688 = vst [vmem:[%s1780_s4 + $0x58] sm:$0xff] %v624_v14  ;;  %v499_v22 = vadd.f32 %v1127_v12, %v430_v16  ;;  %v431_v23 = vmul.f32 %v908_v17, %v1110_v4  ;;  %v911_v24 = vunpack.c.l.bf16 %v1043_v13  ;;  %v784_v25 = vunpack.c.h.bf16 %v1012_v7 }
  0x21   :  { %689 = vst [vmem:[%s1780_s4 + $0x60] sm:$0xff] %v625_v18  ;;  %v626_v28 = vmax.f32 %v562_v19, 0.0  ;;  %v234_v29 = vadd.f32 %v1115_v6, %v165_v20  ;;  %v166_v30 = vmul.f32 %v783_v21, %v1102_v1  ;;  %v912_v31 = vunpack.c.h.bf16 %v1043_v13  ;;  %v1016_v20 = vld [vmem:[%s1776_s0 + $0x60] sm:$0xff]  }
  0x22   :  { %v563_v32 = vadd.f32 %v499_v22, %v233_v15  ;;  %v500_v33 = vadd.f32 %v1127_v12, %v431_v23  ;;  %v432_v34 = vmul.f32 %v911_v24, %v1110_v4  ;;  %v167_v35 = vmul.f32 %v784_v25, %v1102_v1  ;;  %v1047_v25 = vld [vmem:[%s1778_s2 + $0x60] sm:$0xff]  }
  0x23   :  { %690 = vst [vmem:[%s1780_s4 + $0x68] sm:$0xff] %v626_v28  ;;  %v235_v36 = vadd.f32 %v1115_v6, %v166_v30  ;;  %v433_v37 = vmul.f32 %v912_v31, %v1110_v4  ;;  %v787_v38 = vunpack.c.l.bf16 %v1013_v26  ;;  %v915_v39 = vunpack.c.l.bf16 %v1044_v27 }
  0x24   :  { %v627_v41 = vmax.f32 %v563_v32, 0.0  ;;  %v564_v42 = vadd.f32 %v500_v33, %v234_v29  ;;  %v501_v43 = vadd.f32 %v1127_v12, %v432_v34  ;;  %v236_v44 = vadd.f32 %v1115_v6, %v167_v35  ;;  %v1017_v34 = vld [vmem:[%s1776_s0 + $0x68] sm:$0xff]  }
  0x25   :  { %v502_v45 = vadd.f32 %v1127_v12, %v433_v37  ;;  %v168_v46 = vmul.f32 %v787_v38, %v1102_v1  ;;  %v434_v47 = vmul.f32 %v915_v39, %v1110_v4  ;;  %v788_v48 = vunpack.c.h.bf16 %v1013_v26 }
  0x26   :  { %691 = vst [vmem:[%s1780_s4 + $0x70] sm:$0xff] %v627_v41  ;;  %v628_v50 = vmax.f32 %v564_v42, 0.0  ;;  %v565_v51 = vadd.f32 %v501_v43, %v235_v36  ;;  %v916_v52 = vunpack.c.h.bf16 %v1044_v27  ;;  %v791_v53 = vunpack.c.l.bf16 %v1014_v40  ;;  %v1048_v43 = vld [vmem:[%s1778_s2 + $0x68] sm:$0xff]  }
  0x27   :  { %v566_v54 = vadd.f32 %v502_v45, %v236_v44  ;;  %v237_v55 = vadd.f32 %v1115_v6, %v168_v46  ;;  %v503_v56 = vadd.f32 %v1127_v12, %v434_v47  ;;  %v169_v57 = vmul.f32 %v788_v48, %v1102_v1 }
  0x28   :  { %692 = vst [vmem:[%s1780_s4 + $0x78] sm:$0xff] %v628_v50  ;;  %v629_v58 = vmax.f32 %v565_v51, 0.0  ;;  %v435_v59 = vmul.f32 %v916_v52, %v1110_v4  ;;  %v170_v60 = vmul.f32 %v791_v53, %v1102_v1  ;;  %v919_v61 = vunpack.c.l.bf16 %v1045_v49 }
  0x29   :  { %v630_v0 = vmax.f32 %v566_v54, 0.0  ;;  %v567_v2 = vadd.f32 %v503_v56, %v237_v55  ;;  %v238_v3 = vadd.f32 %v1115_v6, %v169_v57  ;;  %v792_v5 = vunpack.c.h.bf16 %v1014_v40  ;;  %v1018_v56 = vld [vmem:[%s1776_s0 + $0x70] sm:$0xff]  }
  0x2a   :  { %693 = vst [vmem:[%s1780_s4 + $0x80] sm:$0xff] %v629_v58  ;;  %v504_v7 = vadd.f32 %v1127_v12, %v435_v59  ;;  %v239_v8 = vadd.f32 %v1115_v6, %v170_v60  ;;  %v436_v9 = vmul.f32 %v919_v61, %v1110_v4  ;;  %v920_v10 = vunpack.c.h.bf16 %v1045_v49  ;;  %v1049_v57 = vld [vmem:[%s1778_s2 + $0x70] sm:$0xff]  }
  0x2b   :  { %694 = vst [vmem:[%s1780_s4 + $0x88] sm:$0xff] %v630_v0  ;;  %v631_v11 = vmax.f32 %v567_v2, 0.0  ;;  %v171_v13 = vmul.f32 %v792_v5, %v1102_v1  ;;  %v795_v14 = vunpack.c.l.bf16 %v1015_v62  ;;  %v923_v15 = vunpack.c.l.bf16 %v1046_v63 }
  0x2c   :  { %v568_v16 = vadd.f32 %v504_v7, %v238_v3  ;;  %v505_v17 = vadd.f32 %v1127_v12, %v436_v9  ;;  %v437_v18 = vmul.f32 %v920_v10, %v1110_v4  ;;  %v796_v19 = vunpack.c.h.bf16 %v1015_v62 }
  0x2d   :  { %695 = vst [vmem:[%s1780_s4 + $0x90] sm:$0xff] %v631_v11  ;;  %v240_v21 = vadd.f32 %v1115_v6, %v171_v13  ;;  %v172_v22 = vmul.f32 %v795_v14, %v1102_v1  ;;  %v438_v23 = vmul.f32 %v923_v15, %v1110_v4  ;;  %v924_v24 = vunpack.c.h.bf16 %v1046_v63  ;;  %v1019_v14 = vld [vmem:[%s1776_s0 + $0x78] sm:$0xff]  }
  0x2e   :  { %v632_v26 = vmax.f32 %v568_v16, 0.0  ;;  %v569_v27 = vadd.f32 %v505_v17, %v239_v8  ;;  %v506_v28 = vadd.f32 %v1127_v12, %v437_v18  ;;  %v173_v29 = vmul.f32 %v796_v19, %v1102_v1  ;;  %v1050_v19 = vld [vmem:[%s1778_s2 + $0x78] sm:$0xff]  }
  0x2f   :  { %v241_v30 = vadd.f32 %v1115_v6, %v172_v22  ;;  %v507_v31 = vadd.f32 %v1127_v12, %v438_v23  ;;  %v439_v32 = vmul.f32 %v924_v24, %v1110_v4  ;;  %v799_v33 = vunpack.c.l.bf16 %v1016_v20 }
  0x30   :  { %696 = vst [vmem:[%s1780_s4 + $0x98] sm:$0xff] %v632_v26  ;;  %v633_v35 = vmax.f32 %v569_v27, 0.0  ;;  %v570_v36 = vadd.f32 %v506_v28, %v240_v21  ;;  %v242_v37 = vadd.f32 %v1115_v6, %v173_v29  ;;  %v927_v38 = vunpack.c.l.bf16 %v1047_v25  ;;  %v1020_v28 = vld [vmem:[%s1776_s0 + $0x80] sm:$0xff]  }
  0x31   :  { %v571_v39 = vadd.f32 %v507_v31, %v241_v30  ;;  %v508_v40 = vadd.f32 %v1127_v12, %v439_v32  ;;  %v174_v41 = vmul.f32 %v799_v33, %v1102_v1  ;;  %v800_v42 = vunpack.c.h.bf16 %v1016_v20  ;;  %v1051_v33 = vld [vmem:[%s1778_s2 + $0x80] sm:$0xff]  }
  0x32   :  { %697 = vst [vmem:[%s1780_s4 + $0xa0] sm:$0xff] %v633_v35  ;;  %v634_v44 = vmax.f32 %v570_v36, 0.0  ;;  %v440_v45 = vmul.f32 %v927_v38, %v1110_v4  ;;  %v928_v46 = vunpack.c.h.bf16 %v1047_v25  ;;  %v803_v47 = vunpack.c.l.bf16 %v1017_v34 }
  0x33   :  { %v635_v48 = vmax.f32 %v571_v39, 0.0  ;;  %v572_v49 = vadd.f32 %v508_v40, %v242_v37  ;;  %v243_v50 = vadd.f32 %v1115_v6, %v174_v41  ;;  %v175_v51 = vmul.f32 %v800_v42, %v1102_v1 }
  0x34   :  { %698 = vst [vmem:[%s1780_s4 + $0xa8] sm:$0xff] %v634_v44  ;;  %v509_v52 = vadd.f32 %v1127_v12, %v440_v45  ;;  %v441_v53 = vmul.f32 %v928_v46, %v1110_v4  ;;  %v176_v54 = vmul.f32 %v803_v47, %v1102_v1  ;;  %v931_v55 = vunpack.c.l.bf16 %v1048_v43 }
  0x35   :  { %699 = vst [vmem:[%s1780_s4 + $0xb0] sm:$0xff] %v635_v48  ;;  %v636_v58 = vmax.f32 %v572_v49, 0.0  ;;  %v244_v59 = vadd.f32 %v1115_v6, %v175_v51  ;;  %v804_v60 = vunpack.c.h.bf16 %v1017_v34  ;;  %v932_v61 = vunpack.c.h.bf16 %v1048_v43 }
  0x36   :  { %v573_v62 = vadd.f32 %v509_v52, %v243_v50  ;;  %v510_v63 = vadd.f32 %v1127_v12, %v441_v53  ;;  %v245_v0 = vadd.f32 %v1115_v6, %v176_v54  ;;  %v442_v2 = vmul.f32 %v931_v55, %v1110_v4  ;;  %v1021_v50 = vld [vmem:[%s1776_s0 + $0x88] sm:$0xff]  }
  0x37   :  { %700 = vst [vmem:[%s1780_s4 + $0xb8] sm:$0xff] %v636_v58  ;;  %v177_v3 = vmul.f32 %v804_v60, %v1102_v1  ;;  %v443_v5 = vmul.f32 %v932_v61, %v1110_v4  ;;  %v807_v7 = vunpack.c.l.bf16 %v1018_v56  ;;  %v935_v8 = vunpack.c.l.bf16 %v1049_v57  ;;  %v1052_v55 = vld [vmem:[%s1778_s2 + $0x88] sm:$0xff]  }
  0x38   :  { %v637_v9 = vmax.f32 %v573_v62, 0.0  ;;  %v574_v10 = vadd.f32 %v510_v63, %v244_v59  ;;  %v511_v11 = vadd.f32 %v1127_v12, %v442_v2  ;;  %v808_v13 = vunpack.c.h.bf16 %v1018_v56 }
  0x39   :  { %v246_v15 = vadd.f32 %v1115_v6, %v177_v3  ;;  %v512_v16 = vadd.f32 %v1127_v12, %v443_v5  ;;  %v178_v17 = vmul.f32 %v807_v7, %v1102_v1  ;;  %v444_v18 = vmul.f32 %v935_v8, %v1110_v4  ;;  %v1022_v7 = vld [vmem:[%s1776_s0 + $0x90] sm:$0xff]  }
  0x3a   :  { %701 = vst [vmem:[%s1780_s4 + $0xc0] sm:$0xff] %v637_v9  ;;  %v638_v20 = vmax.f32 %v574_v10, 0.0  ;;  %v575_v21 = vadd.f32 %v511_v11, %v245_v0  ;;  %v179_v22 = vmul.f32 %v808_v13, %v1102_v1  ;;  %v936_v23 = vunpack.c.h.bf16 %v1049_v57  ;;  %v1053_v13 = vld [vmem:[%s1778_s2 + $0x90] sm:$0xff]  }
  0x3b   :  { %v576_v24 = vadd.f32 %v512_v16, %v246_v15  ;;  %v247_v25 = vadd.f32 %v1115_v6, %v178_v17  ;;  %v513_v26 = vadd.f32 %v1127_v12, %v444_v18  ;;  %v811_v27 = vunpack.c.l.bf16 %v1019_v14 }
  0x3c   :  { %702 = vst [vmem:[%s1780_s4 + $0xc8] sm:$0xff] %v638_v20  ;;  %v639_v29 = vmax.f32 %v575_v21, 0.0  ;;  %v248_v30 = vadd.f32 %v1115_v6, %v179_v22  ;;  %v445_v31 = vmul.f32 %v936_v23, %v1110_v4  ;;  %v939_v32 = vunpack.c.l.bf16 %v1050_v19  ;;  %v1023_v22 = vld [vmem:[%s1776_s0 + $0x98] sm:$0xff]  }
  0x3d   :  { %v640_v34 = vmax.f32 %v576_v24, 0.0  ;;  %v577_v35 = vadd.f32 %v513_v26, %v247_v25  ;;  %v180_v36 = vmul.f32 %v811_v27, %v1102_v1  ;;  %v812_v37 = vunpack.c.h.bf16 %v1019_v14  ;;  %v1054_v27 = vld [vmem:[%s1778_s2 + $0x98] sm:$0xff]  }
  0x3e   :  { %703 = vst [vmem:[%s1780_s4 + $0xd0] sm:$0xff] %v639_v29  ;;  %v514_v38 = vadd.f32 %v1127_v12, %v445_v31  ;;  %v446_v39 = vmul.f32 %v939_v32, %v1110_v4  ;;  %v940_v40 = vunpack.c.h.bf16 %v1050_v19  ;;  %v815_v41 = vunpack.c.l.bf16 %v1020_v28 }
  0x3f   :  { %704 = vst [vmem:[%s1780_s4 + $0xd8] sm:$0xff] %v640_v34  ;;  %v641_v42 = vmax.f32 %v577_v35, 0.0  ;;  %v249_v43 = vadd.f32 %v1115_v6, %v180_v36  ;;  %v181_v44 = vmul.f32 %v812_v37, %v1102_v1  ;;  %v943_v45 = vunpack.c.l.bf16 %v1051_v33 }
  0x40   :  { %v578_v46 = vadd.f32 %v514_v38, %v248_v30  ;;  %v515_v47 = vadd.f32 %v1127_v12, %v446_v39  ;;  %v447_v48 = vmul.f32 %v940_v40, %v1110_v4  ;;  %v182_v49 = vmul.f32 %v815_v41, %v1102_v1 }
  0x41   :  { %705 = vst [vmem:[%s1780_s4 + $0xe0] sm:$0xff] %v641_v42  ;;  %v250_v51 = vadd.f32 %v1115_v6, %v181_v44  ;;  %v448_v52 = vmul.f32 %v943_v45, %v1110_v4  ;;  %v816_v53 = vunpack.c.h.bf16 %v1020_v28  ;;  %v944_v54 = vunpack.c.h.bf16 %v1051_v33  ;;  %v1024_v44 = vld [vmem:[%s1776_s0 + $0xa0] sm:$0xff]  }
  0x42   :  { %v642_v56 = vmax.f32 %v578_v46, 0.0  ;;  %v579_v57 = vadd.f32 %v515_v47, %v249_v43  ;;  %v516_v58 = vadd.f32 %v1127_v12, %v447_v48  ;;  %v251_v59 = vadd.f32 %v1115_v6, %v182_v49  ;;  %v1055_v49 = vld [vmem:[%s1778_s2 + $0xa0] sm:$0xff]  }
  0x43   :  { %v517_v60 = vadd.f32 %v1127_v12, %v448_v52  ;;  %v183_v61 = vmul.f32 %v816_v53, %v1102_v1  ;;  %v449_v62 = vmul.f32 %v944_v54, %v1110_v4  ;;  %v819_v63 = vunpack.c.l.bf16 %v1021_v50 }
  0x44   :  { %706 = vst [vmem:[%s1780_s4 + $0xe8] sm:$0xff] %v642_v56  ;;  %v643_v0 = vmax.f32 %v579_v57, 0.0  ;;  %v580_v2 = vadd.f32 %v516_v58, %v250_v51  ;;  %v947_v3 = vunpack.c.l.bf16 %v1052_v55  ;;  %v820_v5 = vunpack.c.h.bf16 %v1021_v50 }
  0x45   :  { %v581_v8 = vadd.f32 %v517_v60, %v251_v59  ;;  %v252_v9 = vadd.f32 %v1115_v6, %v183_v61  ;;  %v518_v10 = vadd.f32 %v1127_v12, %v449_v62  ;;  %v184_v11 = vmul.f32 %v819_v63, %v1102_v1  ;;  %v1025_v62 = vld [vmem:[%s1776_s0 + $0xa8] sm:$0xff]  }
  0x46   :  { %707 = vst [vmem:[%s1780_s4 + $0xf0] sm:$0xff] %v643_v0  ;;  %v644_v14 = vmax.f32 %v580_v2, 0.0  ;;  %v450_v15 = vmul.f32 %v947_v3, %v1110_v4  ;;  %v185_v16 = vmul.f32 %v820_v5, %v1102_v1  ;;  %v948_v17 = vunpack.c.h.bf16 %v1052_v55  ;;  %v1056_v63 = vld [vmem:[%s1778_s2 + $0xa8] sm:$0xff]  }
  0x47   :  { %v645_v18 = vmax.f32 %v581_v8, 0.0  ;;  %v582_v19 = vadd.f32 %v518_v10, %v252_v9  ;;  %v253_v20 = vadd.f32 %v1115_v6, %v184_v11  ;;  %v823_v21 = vunpack.c.l.bf16 %v1022_v7 }
  0x48   :  { %708 = vst [vmem:[%s1780_s4 + $0xf8] sm:$0xff] %v644_v14  ;;  %v519_v23 = vadd.f32 %v1127_v12, %v450_v15  ;;  %v254_v24 = vadd.f32 %v1115_v6, %v185_v16  ;;  %v451_v25 = vmul.f32 %v948_v17, %v1110_v4  ;;  %v951_v26 = vunpack.c.l.bf16 %v1053_v13  ;;  %v1026_v16 = vld [vmem:[%s1776_s0 + $0xb0] sm:$0xff]  }
  0x49   :  { %709 = vst [vmem:[%s1780_s4 + $0x100] sm:$0xff] %v645_v18  ;;  %v646_v28 = vmax.f32 %v582_v19, 0.0  ;;  %v186_v29 = vmul.f32 %v823_v21, %v1102_v1  ;;  %v824_v30 = vunpack.c.h.bf16 %v1022_v7  ;;  %v952_v31 = vunpack.c.h.bf16 %v1053_v13 }
  0x4a   :  { %v583_v32 = vadd.f32 %v519_v23, %v253_v20  ;;  %v520_v33 = vadd.f32 %v1127_v12, %v451_v25  ;;  %v452_v34 = vmul.f32 %v951_v26, %v1110_v4  ;;  %v827_v35 = vunpack.c.l.bf16 %v1023_v22  ;;  %v1057_v25 = vld [vmem:[%s1778_s2 + $0xb0] sm:$0xff]  }
  0x4b   :  { %710 = vst [vmem:[%s1780_s4 + $0x108] sm:$0xff] %v646_v28  ;;  %v255_v36 = vadd.f32 %v1115_v6, %v186_v29  ;;  %v187_v37 = vmul.f32 %v824_v30, %v1102_v1  ;;  %v453_v38 = vmul.f32 %v952_v31, %v1110_v4  ;;  %v955_v39 = vunpack.c.l.bf16 %v1054_v27 }
  0x4c   :  { %v647_v40 = vmax.f32 %v583_v32, 0.0  ;;  %v584_v41 = vadd.f32 %v520_v33, %v254_v24  ;;  %v521_v42 = vadd.f32 %v1127_v12, %v452_v34  ;;  %v188_v43 = vmul.f32 %v827_v35, %v1102_v1 }
  0x4d   :  { %v256_v45 = vadd.f32 %v1115_v6, %v187_v37  ;;  %v522_v46 = vadd.f32 %v1127_v12, %v453_v38  ;;  %v454_v47 = vmul.f32 %v955_v39, %v1110_v4  ;;  %v828_v48 = vunpack.c.h.bf16 %v1023_v22  ;;  %v1027_v38 = vld [vmem:[%s1776_s0 + $0xb8] sm:$0xff]  }
  0x4e   :  { %711 = vst [vmem:[%s1780_s4 + $0x110] sm:$0xff] %v647_v40  ;;  %v648_v50 = vmax.f32 %v584_v41, 0.0  ;;  %v585_v51 = vadd.f32 %v521_v42, %v255_v36  ;;  %v257_v52 = vadd.f32 %v1115_v6, %v188_v43  ;;  %v956_v53 = vunpack.c.h.bf16 %v1054_v27  ;;  %v1058_v43 = vld [vmem:[%s1778_s2 + $0xb8] sm:$0xff]  }
  0x4f   :  { %v586_v54 = vadd.f32 %v522_v46, %v256_v45  ;;  %v523_v55 = vadd.f32 %v1127_v12, %v454_v47  ;;  %v189_v56 = vmul.f32 %v828_v48, %v1102_v1  ;;  %v831_v57 = vunpack.c.l.bf16 %v1024_v44 }
  0x50   :  { %712 = vst [vmem:[%s1780_s4 + $0x118] sm:$0xff] %v648_v50  ;;  %v649_v58 = vmax.f32 %v585_v51, 0.0  ;;  %v455_v59 = vmul.f32 %v956_v53, %v1110_v4  ;;  %v959_v60 = vunpack.c.l.bf16 %v1055_v49  ;;  %v832_v61 = vunpack.c.h.bf16 %v1024_v44 }
  0x51   :  { %v650_v0 = vmax.f32 %v586_v54, 0.0  ;;  %v587_v2 = vadd.f32 %v523_v55, %v257_v52  ;;  %v258_v3 = vadd.f32 %v1115_v6, %v189_v56  ;;  %v190_v5 = vmul.f32 %v831_v57, %v1102_v1  ;;  %v1028_v56 = vld [vmem:[%s1776_s0 + $0xc0] sm:$0xff]  }
  0x52   :  { %713 = vst [vmem:[%s1780_s4 + $0x120] sm:$0xff] %v649_v58  ;;  %v524_v7 = vadd.f32 %v1127_v12, %v455_v59  ;;  %v456_v8 = vmul.f32 %v959_v60, %v1110_v4  ;;  %v191_v9 = vmul.f32 %v832_v61, %v1102_v1  ;;  %v960_v10 = vunpack.c.h.bf16 %v1055_v49  ;;  %v1059_v57 = vld [vmem:[%s1778_s2 + $0xc0] sm:$0xff]  }
  0x53   :  { %714 = vst [vmem:[%s1780_s4 + $0x128] sm:$0xff] %v650_v0  ;;  %v651_v11 = vmax.f32 %v587_v2, 0.0  ;;  %v259_v13 = vadd.f32 %v1115_v6, %v190_v5  ;;  %v835_v14 = vunpack.c.l.bf16 %v1025_v62  ;;  %v963_v15 = vunpack.c.l.bf16 %v1056_v63 }
  0x54   :  { %v588_v17 = vadd.f32 %v524_v7, %v258_v3  ;;  %v525_v18 = vadd.f32 %v1127_v12, %v456_v8  ;;  %v260_v19 = vadd.f32 %v1115_v6, %v191_v9  ;;  %v457_v20 = vmul.f32 %v960_v10, %v1110_v4  ;;  %v1029_v9 = vld [vmem:[%s1776_s0 + $0xc8] sm:$0xff]  }
  0x55   :  { %715 = vst [vmem:[%s1780_s4 + $0x130] sm:$0xff] %v651_v11  ;;  %v192_v21 = vmul.f32 %v835_v14, %v1102_v1  ;;  %v458_v22 = vmul.f32 %v963_v15, %v1110_v4  ;;  %v836_v23 = vunpack.c.h.bf16 %v1025_v62  ;;  %v964_v24 = vunpack.c.h.bf16 %v1056_v63 }
  0x56   :  { %v652_v26 = vmax.f32 %v588_v17, 0.0  ;;  %v589_v27 = vadd.f32 %v525_v18, %v259_v13  ;;  %v526_v28 = vadd.f32 %v1127_v12, %v457_v20  ;;  %v839_v29 = vunpack.c.l.bf16 %v1026_v16 }
  0x57   :  { %v261_v30 = vadd.f32 %v1115_v6, %v192_v21  ;;  %v527_v31 = vadd.f32 %v1127_v12, %v458_v22  ;;  %v193_v32 = vmul.f32 %v836_v23, %v1102_v1  ;;  %v459_v33 = vmul.f32 %v964_v24, %v1110_v4 }
  0x58   :  { %716 = vst [vmem:[%s1780_s4 + $0x138] sm:$0xff] %v652_v26  ;;  %v653_v34 = vmax.f32 %v589_v27, 0.0  ;;  %v590_v35 = vadd.f32 %v526_v28, %v260_v19  ;;  %v194_v36 = vmul.f32 %v839_v29, %v1102_v1  ;;  %v967_v37 = vunpack.c.l.bf16 %v1057_v25  ;;  %v1060_v19 = vld [vmem:[%s1778_s2 + $0xc8] sm:$0xff]  }
  0x59   :  { %v591_v39 = vadd.f32 %v527_v31, %v261_v30  ;;  %v262_v40 = vadd.f32 %v1115_v6, %v193_v32  ;;  %v528_v41 = vadd.f32 %v1127_v12, %v459_v33  ;;  %v840_v42 = vunpack.c.h.bf16 %v1026_v16  ;;  %v1030_v32 = vld [vmem:[%s1776_s0 + $0xd0] sm:$0xff]  }
  0x5a   :  { %717 = vst [vmem:[%s1780_s4 + $0x140] sm:$0xff] %v653_v34  ;;  %v654_v44 = vmax.f32 %v590_v35, 0.0  ;;  %v263_v45 = vadd.f32 %v1115_v6, %v194_v36  ;;  %v460_v46 = vmul.f32 %v967_v37, %v1110_v4  ;;  %v968_v47 = vunpack.c.h.bf16 %v1057_v25  ;;  %v1061_v33 = vld [vmem:[%s1778_s2 + $0xd0] sm:$0xff]  }
  0x5b   :  { %v655_v48 = vmax.f32 %v591_v39, 0.0  ;;  %v592_v49 = vadd.f32 %v528_v41, %v262_v40  ;;  %v195_v50 = vmul.f32 %v840_v42, %v1102_v1  ;;  %v843_v51 = vunpack.c.l.bf16 %v1027_v38 }
  0x5c   :  { %718 = vst [vmem:[%s1780_s4 + $0x148] sm:$0xff] %v654_v44  ;;  %v529_v52 = vadd.f32 %v1127_v12, %v460_v46  ;;  %v461_v53 = vmul.f32 %v968_v47, %v1110_v4  ;;  %v971_v54 = vunpack.c.l.bf16 %v1058_v43  ;;  %v844_v55 = vunpack.c.h.bf16 %v1027_v38 }
  0x5d   :  { %719 = vst [vmem:[%s1780_s4 + $0x150] sm:$0xff] %v655_v48  ;;  %v656_v58 = vmax.f32 %v592_v49, 0.0  ;;  %v264_v59 = vadd.f32 %v1115_v6, %v195_v50  ;;  %v196_v60 = vmul.f32 %v843_v51, %v1102_v1  ;;  %v972_v61 = vunpack.c.h.bf16 %v1058_v43  ;;  %v1630_v48 = vld [vmem:[%s1779_s3] ss:$0 sm:$0xff]  ;;  %v1031_v49 = vld [vmem:[%s1776_s0 + $0xd8] sm:$0xff]  }
  0x5e   :  { %v593_v62 = vadd.f32 %v529_v52, %v263_v45  ;;  %v530_v63 = vadd.f32 %v1127_v12, %v461_v53  ;;  %v462_v0 = vmul.f32 %v971_v54, %v1110_v4  ;;  %v197_v2 = vmul.f32 %v844_v55, %v1102_v1  ;;  %v1648_v50 = vld [vmem:[%s1777_s1] ss:$0 sm:$0xff]  ;;  %v1062_v54 = vld [vmem:[%s1778_s2 + $0xd8] sm:$0xff]  }
  0x5f   :  { %720 = vst [vmem:[%s1780_s4 + $0x158] sm:$0xff] %v656_v58  ;;  %v265_v3 = vadd.f32 %v1115_v6, %v196_v60  ;;  %v463_v5 = vmul.f32 %v972_v61, %v1110_v4  ;;  %v847_v7 = vunpack.c.l.bf16 %v1028_v56  ;;  %v975_v8 = vunpack.c.l.bf16 %v1059_v57 }
  0x60   :  { %v657_v10 = vmax.f32 %v593_v62, 0.0  ;;  %v594_v11 = vadd.f32 %v530_v63, %v264_v59  ;;  %v531_v13 = vadd.f32 %v1127_v12, %v462_v0  ;;  %v266_v14 = vadd.f32 %v1115_v6, %v197_v2  ;;  %v1032_v0 = vld [vmem:[%s1776_s0 + $0xe0] sm:$0xff]  }
  0x61   :  { %v532_v15 = vadd.f32 %v1127_v12, %v463_v5  ;;  %v198_v16 = vmul.f32 %v847_v7, %v1102_v1  ;;  %v464_v17 = vmul.f32 %v975_v8, %v1110_v4  ;;  %v848_v18 = vunpack.c.h.bf16 %v1028_v56 }
  0x62   :  { %721 = vst [vmem:[%s1780_s4 + $0x160] sm:$0xff] %v657_v10  ;;  %v658_v20 = vmax.f32 %v594_v11, 0.0  ;;  %v595_v21 = vadd.f32 %v531_v13, %v265_v3  ;;  %v976_v22 = vunpack.c.h.bf16 %v1059_v57  ;;  %v851_v23 = vunpack.c.l.bf16 %v1029_v9  ;;  %v1658_v57 = vld [vmem:[%s1779_s3 + $0x1] ss:$0 sm:$0xff] }
  0x63   :  { %v596_v24 = vadd.f32 %v532_v15, %v266_v14  ;;  %v267_v25 = vadd.f32 %v1115_v6, %v198_v16  ;;  %v533_v26 = vadd.f32 %v1127_v12, %v464_v17  ;;  %v199_v27 = vmul.f32 %v848_v18, %v1102_v1  ;;  %v1063_v13 = vld [vmem:[%s1778_s2 + $0xe0] sm:$0xff]  }
  0x64   :  { %722 = vst [vmem:[%s1780_s4 + $0x168] sm:$0xff] %v658_v20  ;;  %v659_v28 = vmax.f32 %v595_v21, 0.0  ;;  %v465_v29 = vmul.f32 %v976_v22, %v1110_v4  ;;  %v200_v30 = vmul.f32 %v851_v23, %v1102_v1  ;;  %v979_v31 = vunpack.c.l.bf16 %v1060_v19 }
  0x65   :  { %v660_v34 = vmax.f32 %v596_v24, 0.0  ;;  %v597_v35 = vadd.f32 %v533_v26, %v267_v25  ;;  %v268_v36 = vadd.f32 %v1115_v6, %v199_v27  ;;  %v852_v37 = vunpack.c.h.bf16 %v1029_v9  ;;  %v1033_v26 = vld [vmem:[%s1776_s0 + $0xe8] sm:$0xff]  }
  0x66   :  { %723 = vst [vmem:[%s1780_s4 + $0x170] sm:$0xff] %v659_v28  ;;  %v534_v38 = vadd.f32 %v1127_v12, %v465_v29  ;;  %v269_v39 = vadd.f32 %v1115_v6, %v200_v30  ;;  %v466_v40 = vmul.f32 %v979_v31, %v1110_v4  ;;  %v980_v41 = vunpack.c.h.bf16 %v1060_v19  ;;  %v1064_v27 = vld [vmem:[%s1778_s2 + $0xe8] sm:$0xff]  }
  0x67   :  { %724 = vst [vmem:[%s1780_s4 + $0x178] sm:$0xff] %v660_v34  ;;  %v661_v42 = vmax.f32 %v597_v35, 0.0  ;;  %v201_v43 = vmul.f32 %v852_v37, %v1102_v1  ;;  %v855_v44 = vunpack.c.l.bf16 %v1030_v32  ;;  %v983_v45 = vunpack.c.l.bf16 %v1061_v33  ;;  %v1642_v1 = vld [vmem:[%s1777_s1 + $0x1] ss:$0 sm:$0xff] }
  0x68   :  { %v598_v46 = vadd.f32 %v534_v38, %v268_v36  ;;  %v535_v47 = vadd.f32 %v1127_v12, %v466_v40  ;;  %v467_v4 = vmul.f32 %v1630_v48, %v980_v41  ;;  %v856_v6 = vunpack.c.h.bf16 %v1030_v32 }
  0x69   :  { %725 = vst [vmem:[%s1780_s4 + $0x180] sm:$0xff] %v661_v42  ;;  %v270_v12 = vadd.f32 %v1642_v1, %v201_v43  ;;  %v202_v51 = vmul.f32 %v1648_v50, %v855_v44  ;;  %v468_v52 = vmul.f32 %v1630_v48, %v983_v45  ;;  %v984_v53 = vunpack.c.h.bf16 %v1061_v33  ;;  %v1034_v44 = vld [vmem:[%s1776_s0 + $0xf0] sm:$0xff]  }
  0x6a   :  { %v662_v55 = vmax.f32 %v598_v46, 0.0  ;;  %v599_v56 = vadd.f32 %v535_v47, %v269_v39  ;;  %v536_v58 = vadd.f32 %v1658_v57, %v467_v4  ;;  %v203_v59 = vmul.f32 %v1648_v50, %v856_v6  ;;  %v1065_v6 = vld [vmem:[%s1778_s2 + $0xf0] sm:$0xff]  }
  0x6b   :  { %v271_v60 = vadd.f32 %v1642_v1, %v202_v51  ;;  %v537_v61 = vadd.f32 %v1658_v57, %v468_v52  ;;  %v469_v62 = vmul.f32 %v1630_v48, %v984_v53  ;;  %v859_v63 = vunpack.c.l.bf16 %v1031_v49 }
  0x6c   :  { %726 = vst [vmem:[%s1780_s4 + $0x188] sm:$0xff] %v662_v55  ;;  %v663_v2 = vmax.f32 %v599_v56, 0.0  ;;  %v600_v3 = vadd.f32 %v536_v58, %v270_v12  ;;  %v272_v5 = vadd.f32 %v1642_v1, %v203_v59  ;;  %v987_v7 = vunpack.c.l.bf16 %v1062_v54  ;;  %v1035_v58 = vld [vmem:[%s1776_s0 + $0xf8] sm:$0xff]  }
  0x6d   :  { %v601_v8 = vadd.f32 %v537_v61, %v271_v60  ;;  %v538_v9 = vadd.f32 %v1658_v57, %v469_v62  ;;  %v204_v10 = vmul.f32 %v1648_v50, %v859_v63  ;;  %v860_v11 = vunpack.c.h.bf16 %v1031_v49  ;;  %v1066_v63 = vld [vmem:[%s1778_s2 + $0xf8] sm:$0xff]  }
  0x6e   :  { %727 = vst [vmem:[%s1780_s4 + $0x190] sm:$0xff] %v663_v2  ;;  %v664_v14 = vmax.f32 %v600_v3, 0.0  ;;  %v470_v15 = vmul.f32 %v1630_v48, %v987_v7  ;;  %v988_v16 = vunpack.c.h.bf16 %v1062_v54  ;;  %v863_v17 = vunpack.c.l.bf16 %v1032_v0 }
  0x6f   :  { %v665_v18 = vmax.f32 %v601_v8, 0.0  ;;  %v602_v19 = vadd.f32 %v538_v9, %v272_v5  ;;  %v273_v20 = vadd.f32 %v1642_v1, %v204_v10  ;;  %v205_v21 = vmul.f32 %v1648_v50, %v860_v11 }
  0x70   :  { %728 = vst [vmem:[%s1780_s4 + $0x198] sm:$0xff] %v664_v14  ;;  %v539_v22 = vadd.f32 %v1658_v57, %v470_v15  ;;  %v471_v23 = vmul.f32 %v1630_v48, %v988_v16  ;;  %v206_v24 = vmul.f32 %v1648_v50, %v863_v17  ;;  %v991_v25 = vunpack.c.l.bf16 %v1063_v13 }
  0x71   :  { %729 = vst [vmem:[%s1780_s4 + $0x1a0] sm:$0xff] %v665_v18  ;;  %v666_v28 = vmax.f32 %v602_v19, 0.0  ;;  %v274_v29 = vadd.f32 %v1642_v1, %v205_v21  ;;  %v864_v30 = vunpack.c.h.bf16 %v1032_v0  ;;  %v992_v31 = vunpack.c.h.bf16 %v1063_v13 }
  0x72   :  { %v603_v32 = vadd.f32 %v539_v22, %v273_v20  ;;  %v540_v33 = vadd.f32 %v1658_v57, %v471_v23  ;;  %v275_v34 = vadd.f32 %v1642_v1, %v206_v24  ;;  %v472_v35 = vmul.f32 %v1630_v48, %v991_v25 }
  0x73   :  { %730 = vst [vmem:[%s1780_s4 + $0x1a8] sm:$0xff] %v666_v28  ;;  %v207_v36 = vmul.f32 %v1648_v50, %v864_v30  ;;  %v473_v37 = vmul.f32 %v1630_v48, %v992_v31  ;;  %v867_v38 = vunpack.c.l.bf16 %v1033_v26  ;;  %v995_v39 = vunpack.c.l.bf16 %v1064_v27 }
  0x74   :  { %v667_v40 = vmax.f32 %v603_v32, 0.0  ;;  %v604_v41 = vadd.f32 %v540_v33, %v274_v29  ;;  %v541_v42 = vadd.f32 %v1658_v57, %v472_v35  ;;  %v868_v43 = vunpack.c.h.bf16 %v1033_v26 }
  0x75   :  { %v276_v45 = vadd.f32 %v1642_v1, %v207_v36  ;;  %v542_v46 = vadd.f32 %v1658_v57, %v473_v37  ;;  %v208_v47 = vmul.f32 %v1648_v50, %v867_v38  ;;  %v474_v4 = vmul.f32 %v1630_v48, %v995_v39 }
  0x76   :  { %731 = vst [vmem:[%s1780_s4 + $0x1b0] sm:$0xff] %v667_v40  ;;  %v668_v49 = vmax.f32 %v604_v41, 0.0  ;;  %v605_v12 = vadd.f32 %v541_v42, %v275_v34  ;;  %v209_v51 = vmul.f32 %v1648_v50, %v868_v43  ;;  %v996_v52 = vunpack.c.h.bf16 %v1064_v27 }
  0x77   :  { %v606_v53 = vadd.f32 %v542_v46, %v276_v45  ;;  %v277_v54 = vadd.f32 %v1642_v1, %v208_v47  ;;  %v543_v55 = vadd.f32 %v1658_v57, %v474_v4  ;;  %v871_v56 = vunpack.c.l.bf16 %v1034_v44 }
  0x78   :  { %732 = vst [vmem:[%s1780_s4 + $0x1b8] sm:$0xff] %v668_v49  ;;  %v669_v59 = vmax.f32 %v605_v12, 0.0  ;;  %v278_v60 = vadd.f32 %v1642_v1, %v209_v51  ;;  %v475_v61 = vmul.f32 %v1630_v48, %v996_v52  ;;  %v999_v62 = vunpack.c.l.bf16 %v1065_v6 }
  0x79   :  { %v670_v0 = vmax.f32 %v606_v53, 0.0  ;;  %v607_v2 = vadd.f32 %v543_v55, %v277_v54  ;;  %v210_v3 = vmul.f32 %v1648_v50, %v871_v56  ;;  %v872_v5 = vunpack.c.h.bf16 %v1034_v44 }
  0x7a   :  { %733 = vst [vmem:[%s1780_s4 + $0x1c0] sm:$0xff] %v669_v59  ;;  %v544_v7 = vadd.f32 %v1658_v57, %v475_v61  ;;  %v476_v8 = vmul.f32 %v1630_v48, %v999_v62  ;;  %v1000_v9 = vunpack.c.h.bf16 %v1065_v6  ;;  %v875_v10 = vunpack.c.l.bf16 %v1035_v58 }
  0x7b   :  { %734 = vst [vmem:[%s1780_s4 + $0x1c8] sm:$0xff] %v670_v0  ;;  %v671_v11 = vmax.f32 %v607_v2, 0.0  ;;  %v279_v13 = vadd.f32 %v1642_v1, %v210_v3  ;;  %v211_v14 = vmul.f32 %v1648_v50, %v872_v5  ;;  %v1003_v15 = vunpack.c.l.bf16 %v1066_v63 }
  0x7c   :  { %v608_v16 = vadd.f32 %v544_v7, %v278_v60  ;;  %v545_v17 = vadd.f32 %v1658_v57, %v476_v8  ;;  %v477_v18 = vmul.f32 %v1630_v48, %v1000_v9  ;;  %v212_v19 = vmul.f32 %v1648_v50, %v875_v10 }
  0x7d   :  { %735 = vst [vmem:[%s1780_s4 + $0x1d0] sm:$0xff] %v671_v11  ;;  %v280_v20 = vadd.f32 %v1642_v1, %v211_v14  ;;  %v478_v21 = vmul.f32 %v1630_v48, %v1003_v15  ;;  %v876_v22 = vunpack.c.h.bf16 %v1035_v58  ;;  %v1004_v23 = vunpack.c.h.bf16 %v1066_v63 }
  0x7e   :  { %v672_v24 = vmax.f32 %v608_v16, 0.0  ;;  %v609_v25 = vadd.f32 %v545_v17, %v279_v13  ;;  %v546_v26 = vadd.f32 %v1658_v57, %v477_v18  ;;  %v281_v27 = vadd.f32 %v1642_v1, %v212_v19 }
  0x7f   :  { %v547_v28 = vadd.f32 %v1658_v57, %v478_v21  ;;  %v213_v29 = vmul.f32 %v1648_v50, %v876_v22  ;;  %v479_v30 = vmul.f32 %v1630_v48, %v1004_v23 }
  0x80   :  { %736 = vst [vmem:[%s1780_s4 + $0x1d8] sm:$0xff] %v672_v24  ;;  %v673_v31 = vmax.f32 %v609_v25, 0.0  ;;  %v610_v32 = vadd.f32 %v546_v26, %v280_v20 }
  0x81   :  { %v611_v33 = vadd.f32 %v547_v28, %v281_v27  ;;  %v282_v34 = vadd.f32 %v1642_v1, %v213_v29  ;;  %v548_v35 = vadd.f32 %v1658_v57, %v479_v30 }
  0x82   :  { %737 = vst [vmem:[%s1780_s4 + $0x1e0] sm:$0xff] %v673_v31  ;;  %v674_v36 = vmax.f32 %v610_v32, 0.0 }
  0x83   :  { %v675_v37 = vmax.f32 %v611_v33, 0.0  ;;  %v612_v50 = vadd.f32 %v548_v35, %v282_v34 }
  0x84   :  { %738 = vst [vmem:[%s1780_s4 + $0x1e8] sm:$0xff] %v674_v36 }
  0x85   :  { %739 = vst [vmem:[%s1780_s4 + $0x1f0] sm:$0xff] %v675_v37  ;;  %v676_v48 = vmax.f32 %v612_v50, 0.0 }
  0x87   :  { %740 = vst [vmem:[%s1780_s4 + $0x1f8] sm:$0xff] %v676_v48 }

</bundles_post_ra>
